<compile_context>
chip_gen: v7x
topology: tpu7x:2x2x1
jax: 0.10.0
libtpu: 0.0.40
codegen_flags: <defaults>
</compile_context>

<pallas_src>
import functools

import jax
import jax.numpy as jnp
import numpy as np
from jax import lax
from jax.experimental import pallas as pl
from jax.experimental.pallas import tpu as pltpu


# Output-parity phases of the stride-2 transposed conv and their non-zero taps.
# For an output pixel with (row, col) parity (ph, pw) at phase-grid coords (i, j):
#   out[2i+ph, 2j+pw] = sum_{(a,b,kh,kw) in taps} x_pad[i+a, j+b] @ W[:, :, kh, kw]
# where x_pad is x zero-padded by 1 on every spatial side. All other entries of the
# naive 9*Cin im2col are structural zeros and are never touched.
_PHASES = ((0, 0), (0, 1), (1, 0), (1, 1))
_TAPS = {
    (0, 0): ((0, 0, 2, 2), (0, 1, 2, 0), (1, 0, 0, 2), (1, 1, 0, 0)),
    (0, 1): ((0, 1, 2, 1), (1, 1, 0, 1)),
    (1, 0): ((1, 0, 1, 2), (1, 1, 1, 0)),
    (1, 1): ((1, 1, 1, 1),),
}


def _transition_up_kernel(x_ref, w_ref, b_ref, *o_refs,
                          phase_params, tile_r, cin, coutp):
    # x_ref : (1, Hp, Wp, Cin)            bf16  zero-padded NHWC activation (whole image, resident)
    # w_ref : (3, 3, Cin, Coutp)          bf16  ConvTranspose2d weights, Cout padded to 128 lanes
    # b_ref : (1, Coutp)                  f32   bias (padded lanes are zero)
    # o_refs[p]: (1, tile_r, nc_p, Coutp) f32   planar conv output tile for parity phase p
    t = pl.program_id(1)                      # row-tile index within the phase sub-grid
    bias = b_ref[...]                         # f32 epilogue (v5e-safe)
    for o_ref, (i0, j0, nc, taps) in zip(o_refs, phase_params):
        row0 = i0 + t * tile_r
        # tile_r + 1 input rows cover both vertical taps (a in {0,1}) of this tile.
        xr = x_ref[0, pl.ds(row0, tile_r + 1), :, :]          # (tile_r+1, Wp, Cin) bf16
        acc = None
        for a, b, kh, kw in taps:                             # only the non-zero taps
            xs = xr[a:a + tile_r, j0 + b:j0 + b + nc, :]      # static slices of the VMEM tile
            p = jnp.dot(xs.reshape(tile_r * nc, cin), w_ref[kh, kw],
                        preferred_element_type=jnp.float32)
            acc = (p + bias) if acc is None else (acc + p)    # bias folded into first tap
        o_ref[0, :, :, :] = acc.reshape(tile_r, nc, coutp)    # lane-dense: Coutp % 128 == 0


def _interleave(a, b, axis, total):
    """Interleave a (even indices) and b (odd indices) along `axis`; result length `total`.

    Pure pad/stack/reshape/slice — no scatter, no zeros materialization.
    """
    if b.shape[axis] < a.shape[axis]:
        pad = [(0, 0)] * a.ndim
        pad[axis] = (0, a.shape[axis] - b.shape[axis])
        b = jnp.pad(b, pad)
    s = jnp.stack([a, b], axis=axis + 1)
    shp = list(a.shape)
    shp[axis] = 2 * a.shape[axis]
    s = s.reshape(shp)
    return lax.slice_in_dim(s, 0, total, axis=axis)


def transition_up(x, skip, weight, bias, *, tile_r=None):
    """ConvTranspose2d(k=3, s=2, p=0, bias) -> center_crop(to skip HxW) -> concat([conv, skip], C).

    x: (N, Cin, H, W); skip: (N, Cs, Hs, Ws); weight: (Cin, Cout, 3, 3); bias: (Cout,).
    Returns (N, Cout + Cs, Hs, Ws) float32.
    """
    N, Cin, H, W = x.shape
    Ns, Cs, Hs, Ws = skip.shape
    Cout = weight.shape[1]
    Ho, Wo = 2 * H + 1, 2 * W + 1                  # ConvTranspose2d output size
    xy1, xy2 = (Wo - Ws) // 2, (Ho - Hs) // 2      # center_crop offsets
    assert N == Ns and xy1 >= 0 and xy2 >= 0 and Hs >= 2 and Ws >= 2

    Coutp = -(-Cout // 128) * 128                  # pad Cout to full 128-lane vregs

    # Static per-phase geometry (Python ints, resolved at trace time).
    # r0/c0 are the cropped-output row/col parities this conv phase lands on.
    phases = []
    for ph, pw in _PHASES:
        r0 = (ph - xy2) % 2
        c0 = (pw - xy1) % 2
        nr = (Hs - r0 + 1) // 2
        nc = (Ws - c0 + 1) // 2
        i0 = (xy2 + r0 - ph) // 2
        j0 = (xy1 + c0 - pw) // 2
        assert nr > 0 and nc > 0
        phases.append((ph, pw, r0, c0, nr, nc, i0, j0, _TAPS[(ph, pw)]))

    nR = max(p[4] for p in phases)
    sum_nc = sum(p[5] for p in phases)

    # Row tiling of the phase sub-grid: biggest tile whose output block fits a ~2 MiB
    # double-buffer budget so the writeback DMA overlaps the matmuls.
    if tile_r is None:
        row_bytes = sum_nc * Coutp * 4
        tile_r = max(1, min(nR, (2 << 20) // max(1, row_bytes)))
    nT = -(-nR // tile_r)
    nR_pad = nT * tile_r

    # NCHW -> NHWC, zero-pad spatially (1 each side + extra bottom rows so every
    # (tile_r + 1)-row window stays in bounds), cast to bf16 for the MXU.
    max_i0 = max(p[6] for p in phases)
    Hp = max(H + 2, max_i0 + nR_pad + 1)
    Wp = W + 2
    x_nhwc = jnp.transpose(x, (0, 2, 3, 1))
    x_pad = jnp.pad(x_nhwc, ((0, 0), (1, Hp - H - 1), (1, 1), (0, 0))).astype(jnp.bfloat16)

    # Weights: (Cin, Cout, 3, 3) -> (3, 3, Cin, Coutp) bf16 (zero columns in the pad);
    # bias -> (1, Coutp) f32.
    w_pk = jnp.transpose(weight, (2, 3, 0, 1))
    w_pk = jnp.pad(w_pk, ((0, 0), (0, 0), (0, 0), (0, Coutp - Cout))).astype(jnp.bfloat16)
    b_pk = jnp.pad(bias, (0, Coutp - Cout)).reshape(1, Coutp).astype(jnp.float32)

    kernel = functools.partial(
        _transition_up_kernel,
        phase_params=tuple((p[6], p[7], p[5], p[8]) for p in phases),
        tile_r=tile_r, cin=Cin, coutp=Coutp)

    out_shape = [jax.ShapeDtypeStruct((N, nR_pad, p[5], Coutp), jnp.float32) for p in phases]
    out_specs = [pl.BlockSpec((1, tile_r, p[5], Coutp), lambda n, t: (n, t, 0, 0))
                 for p in phases]

    # Explicit VMEM budget sized to the (double-buffered) blocks; portable across 16/32/32 MiB
    # default scoped limits on v5e/v6e/v7x while staying under v7x's 64 MiB physical VMEM.
    x_bytes = Hp * Wp * Cin * 2
    out_bytes = tile_r * sum_nc * Coutp * 4
    w_bytes = 9 * Cin * Coutp * 2 + Coutp * 4
    vmem_limit = int(min(max(2 * (x_bytes + out_bytes) + w_bytes + (4 << 20), 8 << 20), 64 << 20))

    phase_outs = pl.pallas_call(
        kernel,
        out_shape=out_shape,
        grid_spec=pltpu.PrefetchScalarGridSpec(
            num_scalar_prefetch=0,
            grid=(N, nT),
            in_specs=[
                pl.BlockSpec((1, Hp, Wp, Cin), lambda n, t: (n, 0, 0, 0)),     # resident over t
                pl.BlockSpec((3, 3, Cin, Coutp), lambda n, t: (0, 0, 0, 0)),
                pl.BlockSpec((1, Coutp), lambda n, t: (0, 0)),
            ],
            out_specs=out_specs,
        ),
        compiler_params=pltpu.CompilerParams(
            dimension_semantics=("parallel", "parallel"),
            vmem_limit_bytes=vmem_limit),
    )(x_pad, w_pk, b_pk)

    # Scatter-free interleave of the 4 parity phases (pad/stack/reshape/slice only),
    # then NHWC -> NCHW and the channel concat with the skip connection.
    by_parity = {}
    for (ph, pw, r0, c0, nr, nc, i0, j0, taps), y in zip(phases, phase_outs):
        by_parity[(r0, c0)] = y[:, :nr, :, :Cout]
    row_even = _interleave(by_parity[(0, 0)], by_parity[(0, 1)], axis=2, total=Ws)
    row_odd = _interleave(by_parity[(1, 0)], by_parity[(1, 1)], axis=2, total=Ws)
    conv = _interleave(row_even, row_odd, axis=1, total=Hs)          # (N, Hs, Ws, Cout)
    conv = jnp.transpose(conv, (0, 3, 1, 2))                         # NHWC -> NCHW
    return jnp.concatenate([conv, skip.astype(jnp.float32)], axis=1)


def _ref_forward(x, skip, weight, bias):
    """Pure numpy reference with PyTorch ConvTranspose2d scatter semantics."""
    x = np.asarray(x, np.float32); skip = np.asarray(skip, np.float32)
    weight = np.asarray(weight, np.float32); bias = np.asarray(bias, np.float32)
    N, Cin, H, W = x.shape
    Cout = weight.shape[1]
    Ho, Wo = 2 * H + 1, 2 * W + 1
    out = np.zeros((N, Cout, Ho, Wo), np.float32)
    for ih in range(H):
        for iw in range(W):
            for kh in range(3):
                for kw in range(3):
                    out[:, :, 2 * ih + kh, 2 * iw + kw] += x[:, :, ih, iw] @ weight[:, :, kh, kw]
    out += bias[None, :, None, None]
    Hs, Ws = skip.shape[2], skip.shape[3]
    xy1, xy2 = (Wo - Ws) // 2, (Ho - Hs) // 2
    out = out[:, :, xy2:xy2 + Hs, xy1:xy1 + Ws]
    return np.concatenate([out, skip], axis=1)


def _bf16(a):
    return np.asarray(jnp.asarray(a).astype(jnp.bfloat16).astype(jnp.float32))


def _check(x, skip, weight, bias, out):
    # Kernel uses bf16 inputs with f32 accumulation -> compare against a bf16-quantized reference.
    ref = _ref_forward(_bf16(x), skip, _bf16(weight), bias)
    assert out.shape == ref.shape, (out.shape, ref.shape)
    np.testing.assert_allclose(np.asarray(out), ref, rtol=1e-4, atol=1e-4)


if __name__ == "__main__":
    key = jax.random.PRNGKey(0)

    # Case 1: typical TransitionUp usage (Hs = 2H); tile_r=8 exercises 2 row-tiles per batch.
    k1, k2, k3, k4, key = jax.random.split(key, 5)
    N, Cin, H, W, Cout, Cs = 2, 4, 16, 16, 6, 5
    Hs, Ws = 2 * H, 2 * W
    x = jax.random.normal(k1, (N, Cin, H, W), jnp.float32)
    skip = jax.random.normal(k2, (N, Cs, Hs, Ws), jnp.float32)
    weight = jax.random.normal(k3, (Cin, Cout, 3, 3), jnp.float32) * 0.1
    bias = jax.random.normal(k4, (Cout,), jnp.float32) * 0.1
    out = jax.jit(functools.partial(transition_up, tile_r=8))(x, skip, weight, bias)
    out = jax.block_until_ready(out)
    _check(x, skip, weight, bias, out)

    # Case 2: odd crop offsets / non-square skip exercise the general phase geometry.
    k1, k2, k3, k4, key = jax.random.split(key, 5)
    N, Cin, H, W, Cout, Cs = 1, 3, 8, 8, 7, 3
    Hs, Ws = 14, 13
    x = jax.random.normal(k1, (N, Cin, H, W), jnp.float32)
    skip = jax.random.normal(k2, (N, Cs, Hs, Ws), jnp.float32)
    weight = jax.random.normal(k3, (Cin, Cout, 3, 3), jnp.float32) * 0.1
    bias = jax.random.normal(k4, (Cout,), jnp.float32) * 0.1
    out = jax.jit(transition_up)(x, skip, weight, bias)
    out = jax.block_until_ready(out)
    _check(x, skip, weight, bias, out)

    print("KERNEL_OK")
</pallas_src>

<mosaic_0001>
module attributes {stable_mosaic.version = 11 : i64} {
  func.func @_transition_up_kernel(%arg0: i32, %arg1: i32, %arg2: memref<1x18x18x4xbf16, #tpu.memory_space<vmem>>, %arg3: memref<3x3x4x128xbf16, #tpu.memory_space<vmem>>, %arg4: memref<1x128xf32, #tpu.memory_space<vmem>>, %arg5: memref<1x8x16x128xf32, #tpu.memory_space<vmem>>, %arg6: memref<1x8x16x128xf32, #tpu.memory_space<vmem>>, %arg7: memref<1x8x16x128xf32, #tpu.memory_space<vmem>>, %arg8: memref<1x8x16x128xf32, #tpu.memory_space<vmem>>) attributes {dimension_semantics = [#tpu.dimension_semantics<parallel>, #tpu.dimension_semantics<parallel>], iteration_bounds = array<i64: 2, 2>, scalar_prefetch = 0 : i64, scratch_operands = 0 : i64, tpu.core_type = #tpu.core_type<tc>, window_params = [{transform_indices = @transform_0, window_bounds = array<i64: 1, 18, 18, 4>}, {pipeline_mode = #tpu.pipeline_mode<synchronous>, transform_indices = @transform_1, window_bounds = array<i64: 3, 3, 4, 128>}, {pipeline_mode = #tpu.pipeline_mode<synchronous>, transform_indices = @transform_2, window_bounds = array<i64: 1, 128>}, {transform_indices = @transform_3, window_bounds = array<i64: 1, 8, 16, 128>}, {transform_indices = @transform_4, window_bounds = array<i64: 1, 8, 16, 128>}, {transform_indices = @transform_5, window_bounds = array<i64: 1, 8, 16, 128>}, {transform_indices = @transform_6, window_bounds = array<i64: 1, 8, 16, 128>}]} {
    %c0 = arith.constant 0 : index
    %c0_0 = arith.constant 0 : index
    %0 = vector.load %arg4[%c0, %c0_0] : memref<1x128xf32, #tpu.memory_space<vmem>>, vector<1x128xf32>
    %c8_i32 = arith.constant 8 : i32
    %1 = arith.muli %arg1, %c8_i32 : i32
    %c0_i32 = arith.constant 0 : i32
    %2 = arith.addi %c0_i32, %1 : i32
    %c0_1 = arith.constant 0 : index
    %3 = arith.index_cast %2 : i32 to index
    %c0_2 = arith.constant 0 : index
    %c0_3 = arith.constant 0 : index
    %4 = vector.load %arg2[%c0_1, %3, %c0_2, %c0_3] : memref<1x18x18x4xbf16, #tpu.memory_space<vmem>>, vector<1x9x18x4xbf16>
    %5 = vector.shape_cast %4 : vector<1x9x18x4xbf16> to vector<9x18x4xbf16>
    %6 = vector.extract_strided_slice %5 {offsets = [0, 0, 0], sizes = [8, 16, 4], strides = [1, 1, 1]} : vector<9x18x4xbf16> to vector<8x16x4xbf16>
    %7 = vector.shape_cast %6 : vector<8x16x4xbf16> to vector<128x4xbf16>
    %c2 = arith.constant 2 : index
    %c2_4 = arith.constant 2 : index
    %c0_5 = arith.constant 0 : index
    %c0_6 = arith.constant 0 : index
    %8 = vector.load %arg3[%c2, %c2_4, %c0_5, %c0_6] : memref<3x3x4x128xbf16, #tpu.memory_space<vmem>>, vector<1x1x4x128xbf16>
    %9 = vector.shape_cast %8 : vector<1x1x4x128xbf16> to vector<4x128xbf16>
    %cst = arith.constant dense<0.000000e+00> : vector<128x128xf32>
    %10 = tpu.matmul %7, %9, %cst {dimension_numbers = #tpu.dot_dimension_numbers<[1], [0], [0], [1], [0, 0, 1, 1], [], []>} : vector<128x4xbf16>, vector<4x128xbf16>, vector<128x128xf32> -> vector<128x128xf32>
    %11 = vector.broadcast %0 : vector<1x128xf32> to vector<128x128xf32>
    %12 = arith.addf %10, %11 : vector<128x128xf32>
    %13 = vector.extract_strided_slice %5 {offsets = [0, 1, 0], sizes = [8, 16, 4], strides = [1, 1, 1]} : vector<9x18x4xbf16> to vector<8x16x4xbf16>
    %14 = vector.shape_cast %13 : vector<8x16x4xbf16> to vector<128x4xbf16>
    %c2_7 = arith.constant 2 : index
    %c0_8 = arith.constant 0 : index
    %c0_9 = arith.constant 0 : index
    %c0_10 = arith.constant 0 : index
    %15 = vector.load %arg3[%c2_7, %c0_8, %c0_9, %c0_10] : memref<3x3x4x128xbf16, #tpu.memory_space<vmem>>, vector<1x1x4x128xbf16>
    %16 = vector.shape_cast %15 : vector<1x1x4x128xbf16> to vector<4x128xbf16>
    %cst_11 = arith.constant dense<0.000000e+00> : vector<128x128xf32>
    %17 = tpu.matmul %14, %16, %cst_11 {dimension_numbers = #tpu.dot_dimension_numbers<[1], [0], [0], [1], [0, 0, 1, 1], [], []>} : vector<128x4xbf16>, vector<4x128xbf16>, vector<128x128xf32> -> vector<128x128xf32>
    %18 = arith.addf %12, %17 : vector<128x128xf32>
    %19 = vector.extract_strided_slice %5 {offsets = [1, 0, 0], sizes = [8, 16, 4], strides = [1, 1, 1]} : vector<9x18x4xbf16> to vector<8x16x4xbf16>
    %20 = vector.shape_cast %19 : vector<8x16x4xbf16> to vector<128x4xbf16>
    %c0_12 = arith.constant 0 : index
    %c2_13 = arith.constant 2 : index
    %c0_14 = arith.constant 0 : index
    %c0_15 = arith.constant 0 : index
    %21 = vector.load %arg3[%c0_12, %c2_13, %c0_14, %c0_15] : memref<3x3x4x128xbf16, #tpu.memory_space<vmem>>, vector<1x1x4x128xbf16>
    %22 = vector.shape_cast %21 : vector<1x1x4x128xbf16> to vector<4x128xbf16>
    %cst_16 = arith.constant dense<0.000000e+00> : vector<128x128xf32>
    %23 = tpu.matmul %20, %22, %cst_16 {dimension_numbers = #tpu.dot_dimension_numbers<[1], [0], [0], [1], [0, 0, 1, 1], [], []>} : vector<128x4xbf16>, vector<4x128xbf16>, vector<128x128xf32> -> vector<128x128xf32>
    %24 = arith.addf %18, %23 : vector<128x128xf32>
    %25 = vector.extract_strided_slice %5 {offsets = [1, 1, 0], sizes = [8, 16, 4], strides = [1, 1, 1]} : vector<9x18x4xbf16> to vector<8x16x4xbf16>
    %26 = vector.shape_cast %25 : vector<8x16x4xbf16> to vector<128x4xbf16>
    %c0_17 = arith.constant 0 : index
    %c0_18 = arith.constant 0 : index
    %c0_19 = arith.constant 0 : index
    %c0_20 = arith.constant 0 : index
    %27 = vector.load %arg3[%c0_17, %c0_18, %c0_19, %c0_20] : memref<3x3x4x128xbf16, #tpu.memory_space<vmem>>, vector<1x1x4x128xbf16>
    %28 = vector.shape_cast %27 : vector<1x1x4x128xbf16> to vector<4x128xbf16>
    %cst_21 = arith.constant dense<0.000000e+00> : vector<128x128xf32>
    %29 = tpu.matmul %26, %28, %cst_21 {dimension_numbers = #tpu.dot_dimension_numbers<[1], [0], [0], [1], [0, 0, 1, 1], [], []>} : vector<128x4xbf16>, vector<4x128xbf16>, vector<128x128xf32> -> vector<128x128xf32>
    %30 = arith.addf %24, %29 : vector<128x128xf32>
    %31 = vector.shape_cast %30 : vector<128x128xf32> to vector<8x16x128xf32>
    %c0_22 = arith.constant 0 : index
    %c0_23 = arith.constant 0 : index
    %c0_24 = arith.constant 0 : index
    %c0_25 = arith.constant 0 : index
    %32 = vector.load %arg5[%c0_22, %c0_23, %c0_24, %c0_25] : memref<1x8x16x128xf32, #tpu.memory_space<vmem>>, vector<1x8x16x128xf32>
    %33 = vector.shape_cast %32 : vector<1x8x16x128xf32> to vector<8x16x128xf32>
    %34 = vector.shape_cast %31 : vector<8x16x128xf32> to vector<1x8x16x128xf32>
    tpu.vector_store %arg5[%c0_22, %c0_23, %c0_24, %c0_25], %34 {strides = array<i32>} : memref<1x8x16x128xf32, #tpu.memory_space<vmem>>, vector<1x8x16x128xf32>,
    %c8_i32_26 = arith.constant 8 : i32
    %35 = arith.muli %arg1, %c8_i32_26 : i32
    %c0_i32_27 = arith.constant 0 : i32
    %36 = arith.addi %c0_i32_27, %35 : i32
    %c0_28 = arith.constant 0 : index
    %37 = arith.index_cast %36 : i32 to index
    %c0_29 = arith.constant 0 : index
    %c0_30 = arith.constant 0 : index
    %38 = vector.load %arg2[%c0_28, %37, %c0_29, %c0_30] : memref<1x18x18x4xbf16, #tpu.memory_space<vmem>>, vector<1x9x18x4xbf16>
    %39 = vector.shape_cast %38 : vector<1x9x18x4xbf16> to vector<9x18x4xbf16>
    %40 = vector.extract_strided_slice %39 {offsets = [0, 1, 0], sizes = [8, 16, 4], strides = [1, 1, 1]} : vector<9x18x4xbf16> to vector<8x16x4xbf16>
    %41 = vector.shape_cast %40 : vector<8x16x4xbf16> to vector<128x4xbf16>
    %c2_31 = arith.constant 2 : index
    %c1 = arith.constant 1 : index
    %c0_32 = arith.constant 0 : index
    %c0_33 = arith.constant 0 : index
    %42 = vector.load %arg3[%c2_31, %c1, %c0_32, %c0_33] : memref<3x3x4x128xbf16, #tpu.memory_space<vmem>>, vector<1x1x4x128xbf16>
    %43 = vector.shape_cast %42 : vector<1x1x4x128xbf16> to vector<4x128xbf16>
    %cst_34 = arith.constant dense<0.000000e+00> : vector<128x128xf32>
    %44 = tpu.matmul %41, %43, %cst_34 {dimension_numbers = #tpu.dot_dimension_numbers<[1], [0], [0], [1], [0, 0, 1, 1], [], []>} : vector<128x4xbf16>, vector<4x128xbf16>, vector<128x128xf32> -> vector<128x128xf32>
    %45 = vector.broadcast %0 : vector<1x128xf32> to vector<128x128xf32>
    %46 = arith.addf %44, %45 : vector<128x128xf32>
    %47 = vector.extract_strided_slice %39 {offsets = [1, 1, 0], sizes = [8, 16, 4], strides = [1, 1, 1]} : vector<9x18x4xbf16> to vector<8x16x4xbf16>
    %48 = vector.shape_cast %47 : vector<8x16x4xbf16> to vector<128x4xbf16>
    %c0_35 = arith.constant 0 : index
    %c1_36 = arith.constant 1 : index
    %c0_37 = arith.constant 0 : index
    %c0_38 = arith.constant 0 : index
    %49 = vector.load %arg3[%c0_35, %c1_36, %c0_37, %c0_38] : memref<3x3x4x128xbf16, #tpu.memory_space<vmem>>, vector<1x1x4x128xbf16>
    %50 = vector.shape_cast %49 : vector<1x1x4x128xbf16> to vector<4x128xbf16>
    %cst_39 = arith.constant dense<0.000000e+00> : vector<128x128xf32>
    %51 = tpu.matmul %48, %50, %cst_39 {dimension_numbers = #tpu.dot_dimension_numbers<[1], [0], [0], [1], [0, 0, 1, 1], [], []>} : vector<128x4xbf16>, vector<4x128xbf16>, vector<128x128xf32> -> vector<128x128xf32>
    %52 = arith.addf %46, %51 : vector<128x128xf32>
    %53 = vector.shape_cast %52 : vector<128x128xf32> to vector<8x16x128xf32>
    %c0_40 = arith.constant 0 : index
    %c0_41 = arith.constant 0 : index
    %c0_42 = arith.constant 0 : index
    %c0_43 = arith.constant 0 : index
    %54 = vector.load %arg6[%c0_40, %c0_41, %c0_42, %c0_43] : memref<1x8x16x128xf32, #tpu.memory_space<vmem>>, vector<1x8x16x128xf32>
    %55 = vector.shape_cast %54 : vector<1x8x16x128xf32> to vector<8x16x128xf32>
    %56 = vector.shape_cast %53 : vector<8x16x128xf32> to vector<1x8x16x128xf32>
    tpu.vector_store %arg6[%c0_40, %c0_41, %c0_42, %c0_43], %56 {strides = array<i32>} : memref<1x8x16x128xf32, #tpu.memory_space<vmem>>, vector<1x8x16x128xf32>,
    %c8_i32_44 = arith.constant 8 : i32
    %57 = arith.muli %arg1, %c8_i32_44 : i32
    %c0_i32_45 = arith.constant 0 : i32
    %58 = arith.addi %c0_i32_45, %57 : i32
    %c0_46 = arith.constant 0 : index
    %59 = arith.index_cast %58 : i32 to index
    %c0_47 = arith.constant 0 : index
    %c0_48 = arith.constant 0 : index
    %60 = vector.load %arg2[%c0_46, %59, %c0_47, %c0_48] : memref<1x18x18x4xbf16, #tpu.memory_space<vmem>>, vector<1x9x18x4xbf16>
    %61 = vector.shape_cast %60 : vector<1x9x18x4xbf16> to vector<9x18x4xbf16>
    %62 = vector.extract_strided_slice %61 {offsets = [1, 0, 0], sizes = [8, 16, 4], strides = [1, 1, 1]} : vector<9x18x4xbf16> to vector<8x16x4xbf16>
    %63 = vector.shape_cast %62 : vector<8x16x4xbf16> to vector<128x4xbf16>
    %c1_49 = arith.constant 1 : index
    %c2_50 = arith.constant 2 : index
    %c0_51 = arith.constant 0 : index
    %c0_52 = arith.constant 0 : index
    %64 = vector.load %arg3[%c1_49, %c2_50, %c0_51, %c0_52] : memref<3x3x4x128xbf16, #tpu.memory_space<vmem>>, vector<1x1x4x128xbf16>
    %65 = vector.shape_cast %64 : vector<1x1x4x128xbf16> to vector<4x128xbf16>
    %cst_53 = arith.constant dense<0.000000e+00> : vector<128x128xf32>
    %66 = tpu.matmul %63, %65, %cst_53 {dimension_numbers = #tpu.dot_dimension_numbers<[1], [0], [0], [1], [0, 0, 1, 1], [], []>} : vector<128x4xbf16>, vector<4x128xbf16>, vector<128x128xf32> -> vector<128x128xf32>
    %67 = vector.broadcast %0 : vector<1x128xf32> to vector<128x128xf32>
    %68 = arith.addf %66, %67 : vector<128x128xf32>
    %69 = vector.extract_strided_slice %61 {offsets = [1, 1, 0], sizes = [8, 16, 4], strides = [1, 1, 1]} : vector<9x18x4xbf16> to vector<8x16x4xbf16>
    %70 = vector.shape_cast %69 : vector<8x16x4xbf16> to vector<128x4xbf16>
    %c1_54 = arith.constant 1 : index
    %c0_55 = arith.constant 0 : index
    %c0_56 = arith.constant 0 : index
    %c0_57 = arith.constant 0 : index
    %71 = vector.load %arg3[%c1_54, %c0_55, %c0_56, %c0_57] : memref<3x3x4x128xbf16, #tpu.memory_space<vmem>>, vector<1x1x4x128xbf16>
    %72 = vector.shape_cast %71 : vector<1x1x4x128xbf16> to vector<4x128xbf16>
    %cst_58 = arith.constant dense<0.000000e+00> : vector<128x128xf32>
    %73 = tpu.matmul %70, %72, %cst_58 {dimension_numbers = #tpu.dot_dimension_numbers<[1], [0], [0], [1], [0, 0, 1, 1], [], []>} : vector<128x4xbf16>, vector<4x128xbf16>, vector<128x128xf32> -> vector<128x128xf32>
    %74 = arith.addf %68, %73 : vector<128x128xf32>
    %75 = vector.shape_cast %74 : vector<128x128xf32> to vector<8x16x128xf32>
    %c0_59 = arith.constant 0 : index
    %c0_60 = arith.constant 0 : index
    %c0_61 = arith.constant 0 : index
    %c0_62 = arith.constant 0 : index
    %76 = vector.load %arg7[%c0_59, %c0_60, %c0_61, %c0_62] : memref<1x8x16x128xf32, #tpu.memory_space<vmem>>, vector<1x8x16x128xf32>
    %77 = vector.shape_cast %76 : vector<1x8x16x128xf32> to vector<8x16x128xf32>
    %78 = vector.shape_cast %75 : vector<8x16x128xf32> to vector<1x8x16x128xf32>
    tpu.vector_store %arg7[%c0_59, %c0_60, %c0_61, %c0_62], %78 {strides = array<i32>} : memref<1x8x16x128xf32, #tpu.memory_space<vmem>>, vector<1x8x16x128xf32>,
    %c8_i32_63 = arith.constant 8 : i32
    %79 = arith.muli %arg1, %c8_i32_63 : i32
    %c0_i32_64 = arith.constant 0 : i32
    %80 = arith.addi %c0_i32_64, %79 : i32
    %c0_65 = arith.constant 0 : index
    %81 = arith.index_cast %80 : i32 to index
    %c0_66 = arith.constant 0 : index
    %c0_67 = arith.constant 0 : index
    %82 = vector.load %arg2[%c0_65, %81, %c0_66, %c0_67] : memref<1x18x18x4xbf16, #tpu.memory_space<vmem>>, vector<1x9x18x4xbf16>
    %83 = vector.shape_cast %82 : vector<1x9x18x4xbf16> to vector<9x18x4xbf16>
    %84 = vector.extract_strided_slice %83 {offsets = [1, 1, 0], sizes = [8, 16, 4], strides = [1, 1, 1]} : vector<9x18x4xbf16> to vector<8x16x4xbf16>
    %85 = vector.shape_cast %84 : vector<8x16x4xbf16> to vector<128x4xbf16>
    %c1_68 = arith.constant 1 : index
    %c1_69 = arith.constant 1 : index
    %c0_70 = arith.constant 0 : index
    %c0_71 = arith.constant 0 : index
    %86 = vector.load %arg3[%c1_68, %c1_69, %c0_70, %c0_71] : memref<3x3x4x128xbf16, #tpu.memory_space<vmem>>, vector<1x1x4x128xbf16>
    %87 = vector.shape_cast %86 : vector<1x1x4x128xbf16> to vector<4x128xbf16>
    %cst_72 = arith.constant dense<0.000000e+00> : vector<128x128xf32>
    %88 = tpu.matmul %85, %87, %cst_72 {dimension_numbers = #tpu.dot_dimension_numbers<[1], [0], [0], [1], [0, 0, 1, 1], [], []>} : vector<128x4xbf16>, vector<4x128xbf16>, vector<128x128xf32> -> vector<128x128xf32>
    %89 = vector.broadcast %0 : vector<1x128xf32> to vector<128x128xf32>
    %90 = arith.addf %88, %89 : vector<128x128xf32>
    %91 = vector.shape_cast %90 : vector<128x128xf32> to vector<8x16x128xf32>
    %c0_73 = arith.constant 0 : index
    %c0_74 = arith.constant 0 : index
    %c0_75 = arith.constant 0 : index
    %c0_76 = arith.constant 0 : index
    %92 = vector.load %arg8[%c0_73, %c0_74, %c0_75, %c0_76] : memref<1x8x16x128xf32, #tpu.memory_space<vmem>>, vector<1x8x16x128xf32>
    %93 = vector.shape_cast %92 : vector<1x8x16x128xf32> to vector<8x16x128xf32>
    %94 = vector.shape_cast %91 : vector<8x16x128xf32> to vector<1x8x16x128xf32>
    tpu.vector_store %arg8[%c0_73, %c0_74, %c0_75, %c0_76], %94 {strides = array<i32>} : memref<1x8x16x128xf32, #tpu.memory_space<vmem>>, vector<1x8x16x128xf32>,
    return
  }
  func.func @transform_0(%arg0: i32, %arg1: i32) -> (i32, i32, i32, i32) {
    %c0_i32 = arith.constant 0 : i32
    %c0_i32_0 = arith.constant 0 : i32
    %c0_i32_1 = arith.constant 0 : i32
    %c0_i32_2 = arith.constant 0 : i32
    return %arg0, %c0_i32, %c0_i32_0, %c0_i32_1 : i32, i32, i32, i32
  }
  func.func @transform_1(%arg0: i32, %arg1: i32) -> (i32, i32, i32, i32) {
    %c0_i32 = arith.constant 0 : i32
    %c0_i32_0 = arith.constant 0 : i32
    %c0_i32_1 = arith.constant 0 : i32
    %c0_i32_2 = arith.constant 0 : i32
    %c0_i32_3 = arith.constant 0 : i32
    return %c0_i32, %c0_i32_0, %c0_i32_1, %c0_i32_2 : i32, i32, i32, i32
  }
  func.func @transform_2(%arg0: i32, %arg1: i32) -> (i32, i32) {
    %c0_i32 = arith.constant 0 : i32
    %c0_i32_0 = arith.constant 0 : i32
    %c0_i32_1 = arith.constant 0 : i32
    return %c0_i32, %c0_i32_0 : i32, i32
  }
  func.func @transform_3(%arg0: i32, %arg1: i32) -> (i32, i32, i32, i32) {
    %c0_i32 = arith.constant 0 : i32
    %c0_i32_0 = arith.constant 0 : i32
    %c0_i32_1 = arith.constant 0 : i32
    return %arg0, %arg1, %c0_i32, %c0_i32_0 : i32, i32, i32, i32
  }
  func.func @transform_4(%arg0: i32, %arg1: i32) -> (i32, i32, i32, i32) {
    %c0_i32 = arith.constant 0 : i32
    %c0_i32_0 = arith.constant 0 : i32
    %c0_i32_1 = arith.constant 0 : i32
    return %arg0, %arg1, %c0_i32, %c0_i32_0 : i32, i32, i32, i32
  }
  func.func @transform_5(%arg0: i32, %arg1: i32) -> (i32, i32, i32, i32) {
    %c0_i32 = arith.constant 0 : i32
    %c0_i32_0 = arith.constant 0 : i32
    %c0_i32_1 = arith.constant 0 : i32
    return %arg0, %arg1, %c0_i32, %c0_i32_0 : i32, i32, i32, i32
  }
  func.func @transform_6(%arg0: i32, %arg1: i32) -> (i32, i32, i32, i32) {
    %c0_i32 = arith.constant 0 : i32
    %c0_i32_0 = arith.constant 0 : i32
    %c0_i32_1 = arith.constant 0 : i32
    return %arg0, %arg1, %c0_i32, %c0_i32_0 : i32, i32, i32, i32
  }
}

</mosaic_0001>

<bundles_post_ra>
// kernel: transition_up.1
= control target key start
LH: loop header
LB: loop body
LE: loop exit
PB: predicated region body
PF: predicated region fallthrough
CT: control target
= control target key end

     0   :  { %s3625_s21 = smov 0   ;;  %s3627_s22 = smov 0   ;;  %s4741_s0 = inlined_call_operand.vmem [shape: bf16[2,18,18,4], index: 0, kind: input, shape index: {}]   ;;  %s4742_s1 = inlined_call_operand.vmem [shape: bf16[3,3,4,128], index: 1, kind: input, shape index: {}]   ;;  %s4743_s2 = inlined_call_operand.vmem [shape: f32[1,128], index: 2, kind: input, shape index: {}]   ;;  %s4744_s3 = inlined_call_operand.vmem [shape: f32[2,16,16,128], index: 3, kind: output, shape index: {0}]   ;;  %s4745_s4 = inlined_call_operand.vmem [shape: f32[2,16,16,128], index: 4, kind: output, shape index: {1}]   ;;  %s4746_s5 = inlined_call_operand.vmem [shape: f32[2,16,16,128], index: 5, kind: output, shape index: {2}]   ;;  %s4747_s6 = inlined_call_operand.vmem [shape: f32[2,16,16,128], index: 6, kind: output, shape index: {3}]  }
   0x1   :  { %s3629_s23 = smov 0   ;;  %s3631_s24 = smov 0  }
   0x2   :  { %s3633_s25 = smov 0  }
   0x3 LB: > { %s26_s26 = sadd.s32 1, %s3580_s23  ;;  %s29_s27 = sadd.s32 1, %s3584_s24  ;;  %s3588_s25 = sphi %s3633_s25, %s17_s25   ;;  %s3584_s24 = sphi %s3631_s24, %s4795_s24   ;;  %s3580_s23 = sphi %s3629_s23, %s4794_s23   ;;  %s3576_s22 = sphi %s3627_s22, %s4793_s22   ;;  %s3572_s21 = sphi %s3625_s21, %s4792_s21  }
   0x4   : > { %p27_p0 = scmp.ge.s32.totalorder %s26_s26, 2  ;;  %p2953_p1 = scmp.ge.s32.totalorder %s3588_s25, 1 }
   0x5   : > { %p239_p2 = scmp.lt.s32.totalorder %s3588_s25, 5 }
   0x6   : > { %s4797_s26 = smov (%p27_p0, %s26_s26), 0  ;;  %s4799_s27 = smov (!%p27_p0, %s29_s27), %s3584_s24 }
   0x7   : > { %p240_p3 = pnand %p2953_p1, %p239_p2  ;;  %p31_p4 = scmp.ge.s32.totalorder %s4799_s27, 2 }
   0x9   : > { %s4801_s27 = smov (%p31_p4, %s4799_s27), 0  ;;  %243 = sbr.rel (%p240_p3) target bundleno = 415 (0x19f), region = 32 }
  0x10   : > { %v2974_v0 = vld [vmem:[%s4742_s1 + $0x10] sm:$0x3]  ;;  %vm459_vm0 = vcmask 1041408   ;;  %p304_p5 = scmp.lt.s32.totalorder %s3576_s22, 1  ;;  %v2992_v2 = vld [vmem:[%s4742_s1 + $0xc] sm:$0x3] }
  0x11   : > { %3482 = vmatprep.subr.msk.bf16.mxu0 %vm459_vm0, %v2974_v0  ;;  %3483 = vmatprep.subr.msk.bf16.mxu1 %vm459_vm0, %v2974_v0  ;;  %v461_v1 = vsel %vm459_vm0, %v2974_v0, 0  ;;  %v3028_v3 = vld [vmem:[%s4742_s1 + $0xe] sm:$0x3]  ;;  %s3108_s10 = smul.u32 96, %s3572_s21  ;;  %v3009_v4 = vld [vmem:[%s4742_s1 + $0x4] sm:$0x3] }
  0x12   : > { %3191 = vmatpush3.bf16.msra.mxu0 %v461_v1  ;;  %3353 = vmatpush3.bf16.msra.mxu1 %v461_v1  ;;  %s4803_s22 = smov (!%p304_p5, %s3576_s22), 1  ;;  %v3681_v5 = vld [vmem:[%s4742_s1 + $0x2] sm:$0x3]  ;;  %vm434_vm1 = vcmask 31744   ;;  %v806_v6 = vsel %vm459_vm0, %v2992_v2, 0  ;;  %v3690_v7 = vsel %vm459_vm0, %v3028_v3, 0 }
  0x13   : > { %3484 = vmatprep.subr.msk.bf16.mxu0 %vm459_vm0, %v2992_v2  ;;  %3487 = vmatprep.subr.msk.bf16.mxu1 %vm459_vm0, %v3028_v3  ;;  %s3492_s11 = smul.u32 216, %s4803_s22  ;;  %v3693_v8 = vsel %vm459_vm0, %v3009_v4, 0  ;;  %v3697_v9 = vsel %vm459_vm0, %v3681_v5, 0  ;;  %vm560_vm2 = vsmask.f32 3328  ;;  %s2957_s13 = sshll.u32 %s4803_s22, 5 }
  0x14   : > { %vm561_vm3 = vsmask.f32 7440 }
  0x15   : > { %s308_s18 = scalar_lea.vmem %s4741_s0, %s3492_s11  ;;  %vm3739_vm4 = vmor %vm560_vm2, %vm561_vm3  ;;  %s2955_s11 = sshll.u32 %s3572_s21, 3 }
  0x16   : > { %s3686_s19 = scalar_lea.vmem %s308_s18, %s3108_s10  ;;  %p312_p6 = scmp.lt.s32.totalorder %s2955_s11, 15 }
  0x17   : > { %v359_v10 = vld [vmem:[%s3686_s19] sm:$0xf]  ;;  %v360_v11 = vld [vmem:[%s3686_s19 + $0x4] sm:$0xf]  ;;  %v371_v12 = vld [vmem:[%s3686_s19 + $0x30] sm:$0xf] }
  0x18   : > { %v2976_v13 = vcombine.low %v359_v10, %v360_v11  ;;  %v564_v14 = vshrl.u32 %v359_v10, 16  ;;  %v567_v15 = vshll.u32 %v359_v10, 16  ;;  %v573_v16 = vshll.u32 %v360_v11, 16  ;;  %v372_v17 = vld [vmem:[%s3686_s19 + $0x34] sm:$0xf]  ;;  %s4805_s11 = smov (!%p312_p6, %s2955_s11), 15 }
  0x19   : > { %v577_v18 = vshrl.u32 %v360_v11, 16  ;;  %v3703_v19 = vcombine.low %v371_v12, %v372_v17  ;;  %v660_v20 = vshrl.u32 %v371_v12, 16  ;;  %v663_v21 = vshll.u32 %v371_v12, 16  ;;  %v362_v22 = vld [vmem:[%s3686_s19 + $0xc] sm:$0xf]  ;;  %s2956_s12 = sshll.u32 %s4805_s11, 1 }
  0x1a   : > { %3192 = vmatprep.mubr.msk.bf16.mxu0 %vm434_vm1, %v2976_v13  ;;  %v566_v23 = vrot.slane %v564_v14, 4  ;;  %v569_v24 = vrot.slane %v567_v15, 5  ;;  %v3707_v25 = vrot.slane %v573_v16, 5  ;;  %v669_v26 = vshll.u32 %v372_v17, 16  ;;  %v363_v27 = vld [vmem:[%s3686_s19 + $0x10] sm:$0xf]  ;;  %s316_s14 = sadd.s32 %s2957_s13, %s2956_s12 }
  0x1b   : > { %v579_v28 = vrot.slane %v577_v18, 4  ;;  %3200 = vmatprep.mubr.msk.bf16.mxu1 %vm434_vm1, %v3703_v19  ;;  %v662_v29 = vrot.slane %v660_v20, 4  ;;  %v665_v30 = vrot.slane %v663_v21, 5  ;;  %v673_v31 = vshrl.u32 %v372_v17, 16  ;;  %v374_v40 = vld [vmem:[%s3686_s19 + $0x3c] sm:$0xf] }
  0x1c   : > { %v570_v32 = vor.u32 %v569_v24, %v566_v23  ;;  %v3712_v33 = vrot.slane %v669_v26, 5  ;;  %v3714_v34 = vcombine.low %v362_v22, %v363_v27  ;;  %v588_v35 = vshrl.u32 %v362_v22, 16  ;;  %v375_v41 = vld [vmem:[%s3686_s19 + $0x40] sm:$0xf]  ;;  %v365_v46 = vld [vmem:[%s3686_s19 + $0x18] sm:$0xf] }
  0x1d   : > { %v580_v36 = vor.u32 %v579_v28, %v3707_v25  ;;  %v666_v37 = vor.u32 %v665_v30, %v662_v29  ;;  %v675_v38 = vrot.slane %v673_v31, 4  ;;  %v591_v39 = vshll.u32 %v362_v22, 16  ;;  %v366_v51 = vld [vmem:[%s3686_s19 + $0x1c] sm:$0xf]  ;;  %v377_v1 = vld [vmem:[%s3686_s19 + $0x48] sm:$0xf] }
  0x1e   : > { %v3719_v42 = vrot.slane %v570_v32, 4  ;;  %3193 = vmatmul.mubr.msk.bf16.vlgmr.msra.gmra.mrb[0].mxu0 %vm434_vm1, %v3714_v34  ;;  %v590_v43 = vrot.slane %v588_v35, 4  ;;  %v597_v44 = vshll.u32 %v363_v27, 16  ;;  %v601_v45 = vshrl.u32 %v363_v27, 16  ;;  %v378_v2 = vld [vmem:[%s3686_s19 + $0x4c] sm:$0xf] }
  0x1f   : > { %v3724_v47 = vrot.slane %v580_v36, 4  ;;  %v3726_v48 = vrot.slane %v666_v37, 4  ;;  %v676_v49 = vor.u32 %v675_v38, %v3712_v33  ;;  %v593_v50 = vrot.slane %v591_v39, 5  ;;  %3209 = vmatpush3.bf16.msra.mxu0 %v806_v6  ;;  %v368_v11 = vld [vmem:[%s3686_s19 + $0x24] sm:$0xf]  ;;  %s4559_s15 = sshll.u32 %s316_s14, 3 }
  0x20   : > { %v3730_v52 = vrot.slane %v597_v44, 5  ;;  %v603_v53 = vrot.slane %v601_v45, 4  ;;  %v3732_v54 = vcombine.low %v374_v40, %v375_v41  ;;  %v684_v55 = vshrl.u32 %v374_v40, 16  ;;  %3485 = vmatprep.subr.msk.bf16.mxu0 %vm459_vm0, %v3009_v4  ;;  %v369_v16 = vld [vmem:[%s3686_s19 + $0x28] sm:$0xf]  ;;  %s4570_s20 = scalar_lea.vmem %s4745_s4, %s4559_s15  ;;  %s4600_s28 = scalar_lea.vmem %s4744_s3, %s4559_s15 }
  0x21   : > { %v3735_v56 = vrot.slane %v676_v49, 4  ;;  %v594_v57 = vor.u32 %v593_v50, %v590_v43  ;;  %v687_v58 = vshll.u32 %v374_v40, 16  ;;  %v693_v59 = vshll.u32 %v375_v41, 16  ;;  %v380_v26 = vld [vmem:[%s3686_s19 + $0x54] sm:$0xf]  ;;  %s4654_s7 = scalar_lea.vmem %s4747_s6, %s4559_s15  ;;  %s4668_s10 = scalar_lea.vmem %s4746_s5, %s4559_s15 }
  0x22   : > { %v604_v61 = vor.u32 %v603_v53, %v3730_v52  ;;  %3201 = vmatmul.mubr.msk.bf16.vlgmr.msra.gmra.mrb[0].mxu1 %vm434_vm1, %v3732_v54  ;;  %v3746_v62 = vrot.slane %v684_v55, 4  ;;  %v697_v63 = vshrl.u32 %v375_v41, 16  ;;  %v3748_v0 = vcombine.low %v365_v46, %v366_v51  ;;  %v381_v30 = vld [vmem:[%s3686_s19 + $0x58] sm:$0xf]  ;;  %v361_v37 = vld [vmem:[%s3686_s19 + $0x8] sm:$0x1] }
  0x23   : > { %v3752_v3 = vrot.slane %v594_v57, 4  ;;  %v3754_v4 = vrot.slane %v687_v58, 5  ;;  %v3756_v6 = vrot.slane %v693_v59, 5  ;;  %3263 = vmatpush3.bf16.msra.mxu1 %v3690_v7  ;;  %v612_v10 = vshrl.u32 %v365_v46, 16  ;;  %v1210_v43 = vld [vmem:[%s3686_s19] sm:$0xf] }
  0x24   : > { %v3760_v12 = vrot.slane %v604_v61, 4  ;;  %v3762_v13 = vrot.slane %v697_v63, 4  ;;  %3196 = vmatprep.mubr.msk.bf16.mxu0 %vm434_vm1, %v3748_v0  ;;  %v615_v14 = vshll.u32 %v365_v46, 16  ;;  %v621_v15 = vshll.u32 %v366_v51, 16  ;;  %3488 = vmatprep.subr.msk.bf16.mxu1 %vm459_vm0, %v3681_v5  ;;  %v1211_v50 = vld [vmem:[%s3686_s19 + $0x4] sm:$0xf] }
  0x25   : > { %v600_v7 = vsel %vm3739_vm4, %v3752_v3, %v3730_v52  ;;  %v3773_v17 = vrot.slane %v612_v10, 4  ;;  %v625_v18 = vshrl.u32 %v366_v51, 16  ;;  %v3775_v20 = vcombine.low %v377_v1, %v378_v2  ;;  %v1212_v58 = vld [vmem:[%s3686_s19 + $0x8] sm:$0x1] }
  0x26   : > { %v3777_v21 = vrot.slane %v615_v14, 5  ;;  %v3779_v22 = vrot.slane %v621_v15, 5  ;;  %v708_v23 = vshrl.u32 %v377_v1, 16  ;;  %v711_v24 = vshll.u32 %v377_v1, 16 }
  0x27   : > { %v3782_v27 = vrot.slane %v625_v18, 4  ;;  %3204 = vmatprep.mubr.msk.bf16.mxu1 %vm434_vm1, %v3775_v20  ;;  %v717_v5 = vshll.u32 %v378_v2, 16  ;;  %v721_v28 = vshrl.u32 %v378_v2, 16  ;;  %v3786_v29 = vcombine.low %v368_v11, %v369_v16  ;;  %v364_v2 = vld [vmem:[%s3686_s19 + $0x14] sm:$0x1] }
  0x28   : > { %v3789_v31 = vrot.slane %v708_v23, 4  ;;  %v3791_v32 = vrot.slane %v711_v24, 5  ;;  %v636_v35 = vshrl.u32 %v368_v11, 16  ;;  %v639_v36 = vshll.u32 %v368_v11, 16 }
  0x29   : > { %v3794_v38 = vrot.slane %v717_v5, 5  ;;  %v3796_v39 = vrot.slane %v721_v28, 4  ;;  %3197 = vmatmul.mubr.msk.bf16.gmra.mrb[4].mxu0 %vm434_vm1, %v3786_v29  ;;  %v645_v40 = vshll.u32 %v369_v16, 16  ;;  %v649_v41 = vshrl.u32 %v369_v16, 16  ;;  %v1213_v16 = vld [vmem:[%s3686_s19 + $0xc] sm:$0xf] }
  0x2a   : > { %v3801_v44 = vrot.slane %v636_v35, 4  ;;  %v3803_v45 = vrot.slane %v639_v36, 5  ;;  %v3805_v46 = vcombine.low %v380_v26, %v381_v30  ;;  %v732_v49 = vshrl.u32 %v380_v26, 16 }
  0x2b   : > { %v3808_v51 = vrot.slane %v645_v40, 5  ;;  %v3810_v53 = vrot.slane %v649_v41, 4  ;;  %v735_v55 = vshll.u32 %v380_v26, 16  ;;  %v741_v57 = vshll.u32 %v381_v30, 16  ;;  %v1215_v40 = vld [vmem:[%s3686_s19 + $0x14] sm:$0x1] }
  0x2c   : > { %3205 = vmatmul.mubr.msk.bf16.gmra.mrb[4].mxu1 %vm434_vm1, %v3805_v46  ;;  %v3815_v59 = vrot.slane %v732_v49, 4  ;;  %v745_v61 = vshrl.u32 %v381_v30, 16  ;;  %v576_v63 = vsel %vm3739_vm4, %v3719_v42, %v3707_v25  ;;  %v583_v1 = vshll.u32 %v361_v37, 16  ;;  %v1214_v42 = vld [vmem:[%s3686_s19 + $0x10] sm:$0xf] }
  0x2d   : > { %v3822_v10 = vrot.slane %v735_v55, 5  ;;  %v3824_v11 = vrot.slane %v741_v57, 5  ;;  %v1238_v14 = vshrl.u32 %v1210_v43, 16  ;;  %v1241_v15 = vshll.u32 %v1210_v43, 16 }
  0x2e   : > { %v3827_v18 = vrot.slane %v745_v61, 4  ;;  %v585_v23 = vrot.slane %v583_v1, 5  ;;  %v1247_v24 = vshll.u32 %v1211_v50, 16  ;;  %v1251_v26 = vshrl.u32 %v1211_v50, 16 }
  0x2f   : > { %v1240_v5 = vrot.slane %v1238_v14, 4  ;;  %v1243_v28 = vrot.slane %v1241_v15, 5  ;;  %v1257_v30 = vshll.u32 %v1212_v58, 16  ;;  %v607_v25 = vshll.u32 %v364_v2, 16 }
  0x30   : > { %v586_v35 = vsel %vm3739_vm4, %v3724_v47, %v585_v23  ;;  %v1249_v36 = vrot.slane %v1247_v24, 5  ;;  %v1253_v37 = vrot.slane %v1251_v26, 4  ;;  %v1262_v41 = vshrl.u32 %v1213_v16, 16  ;;  %v367_v23 = vld [vmem:[%s3686_s19 + $0x20] sm:$0x1] }
  0x31   : > { %v2993_v43 = vcombine.low %v576_v63, %v586_v35  ;;  %v1244_v49 = vor.u32 %v1243_v28, %v1240_v5  ;;  %v1259_v55 = vrot.slane %v1257_v30, 5  ;;  %v609_v57 = vrot.slane %v607_v25, 5  ;;  %v1216_v5 = vld [vmem:[%s3686_s19 + $0x18] sm:$0xf] }
  0x32   : > { %v1254_v50 = vor.u32 %v1253_v37, %v1249_v36  ;;  %v1264_v61 = vrot.slane %v1262_v41, 4  ;;  %v1265_v1 = vshll.u32 %v1213_v16, 16  ;;  %v1271_v58 = vshll.u32 %v1214_v42, 16 }
  0x33   : > { %3210 = vmatprep.mubr.msk.bf16.mxu0 %vm434_vm1, %v2993_v43  ;;  %v1245_v2 = vrot.slane %v1244_v49, 4  ;;  %v610_v47 = vsel %vm3739_vm4, %v3760_v12, %v609_v57  ;;  %v1275_v14 = vshrl.u32 %v1214_v42, 16  ;;  %v1281_v15 = vshll.u32 %v1215_v40, 16  ;;  %v3854_v42 = vld [vmem:[%s4742_s1] sm:$0x3] }
  0x34   : > { %v1255_v63 = vrot.slane %v1254_v50, 4  ;;  %v3844_v24 = vcombine.low %v600_v7, %v610_v47  ;;  %v1267_v16 = vrot.slane %v1265_v1, 5  ;;  %v1273_v26 = vrot.slane %v1271_v58, 5 }
  0x35   : > { %v1250_v28 = vsel %vm3739_vm4, %v1245_v2, %v1249_v36  ;;  %v1277_v30 = vrot.slane %v1275_v14, 4  ;;  %v1283_v12 = vrot.slane %v1281_v15, 5  ;;  %v618_v25 = vor.u32 %v3777_v21, %v3773_v17  ;;  %v1217_v36 = vld [vmem:[%s3686_s19 + $0x1c] sm:$0xf]  ;;  %v370_v14 = vld [vmem:[%s3686_s19 + $0x2c] sm:$0x1] }
  0x36   : > { %v1260_v52 = vsel %vm3739_vm4, %v1255_v63, %v1259_v55  ;;  %3211 = vmatmul.mubr.msk.bf16.vlgmr.msra.gmra.mrb[0].mxu0 %vm434_vm1, %v3844_v24  ;;  %v1268_v3 = vor.u32 %v1267_v16, %v1264_v61  ;;  %v628_v7 = vor.u32 %v3782_v27, %v3779_v22  ;;  %v631_v35 = vshll.u32 %v367_v23, 16  ;;  %v1218_v55 = vld [vmem:[%s3686_s19 + $0x20] sm:$0x1]  ;;  %v1219_v15 = vld [vmem:[%s3686_s19 + $0x24] sm:$0xf] }
  0x37   : > { %v3029_v37 = vcombine.low %v1250_v28, %v1260_v52  ;;  %3227 = vmatpush3.bf16.msra.mxu0 %v3693_v8  ;;  %v1278_v17 = vor.u32 %v1277_v30, %v1273_v26  ;;  %v619_v21 = vrot.slane %v618_v25, 4  ;;  %v1286_v40 = vshrl.u32 %v1216_v5, 16  ;;  %v1220_v25 = vld [vmem:[%s3686_s19 + $0x28] sm:$0xf] }
  0x38   : > { %v1269_v41 = vrot.slane %v1268_v3, 4  ;;  %v629_v43 = vrot.slane %v628_v7, 4  ;;  %v633_v49 = vrot.slane %v631_v35, 5  ;;  %v1289_v57 = vshll.u32 %v1216_v5, 16  ;;  %3486 = vmatprep.subr.msk.bf16.mxu0 %vm459_vm0, %v3854_v42  ;;  %v3893_v35 = vld [vmem:[%s4742_s1 + $0xa] sm:$0x3] }
  0x39   : > { %3264 = vmatprep.mubr.msk.bf16.mxu1 %vm434_vm1, %v3029_v37  ;;  %v1279_v27 = vrot.slane %v1278_v17, 4  ;;  %v624_v8 = vsel %vm3739_vm4, %v619_v21, %v3779_v22  ;;  %v1288_v50 = vrot.slane %v1286_v40, 4  ;;  %v1295_v61 = vshll.u32 %v1217_v36, 16  ;;  %v1221_v37 = vld [vmem:[%s3686_s19 + $0x2c] sm:$0x1] }
  0x3a   : > { %v1274_v1 = vsel %vm3739_vm4, %v1269_v41, %v1273_v26  ;;  %v634_v58 = vsel %vm3739_vm4, %v629_v43, %v633_v49  ;;  %v1291_v2 = vrot.slane %v1289_v57, 5  ;;  %v1299_v47 = vshrl.u32 %v1217_v36, 16 }
  0x3b   : > { %v1284_v23 = vsel %vm3739_vm4, %v1279_v27, %v1283_v12  ;;  %v3879_v63 = vcombine.low %v624_v8, %v634_v58  ;;  %v1297_v16 = vrot.slane %v1295_v61, 5  ;;  %v1305_v22 = vshll.u32 %v1218_v55, 16  ;;  %v373_v27 = vld [vmem:[%s3686_s19 + $0x38] sm:$0x1]  ;;  %v1222_v8 = vld [vmem:[%s3686_s19 + $0x30] sm:$0xf] }
  0x3c   : > { %v3881_v5 = vcombine.low %v1274_v1, %v1284_v23  ;;  %v1292_v28 = vor.u32 %v1291_v2, %v1288_v50  ;;  %v1301_v30 = vrot.slane %v1299_v47, 4  ;;  %v642_v26 = vor.u32 %v3803_v45, %v3801_v44  ;;  %v1223_v58 = vld [vmem:[%s3686_s19 + $0x34] sm:$0xf] }
  0x3d   : > { %3214 = vmatprep.mubr.msk.bf16.mxu0 %vm434_vm1, %v3879_v63  ;;  %v1307_v52 = vrot.slane %v1305_v22, 5  ;;  %v652_v12 = vor.u32 %v3810_v53, %v3808_v51  ;;  %v655_v3 = vshll.u32 %v370_v14, 16  ;;  %v1310_v7 = vshrl.u32 %v1219_v15, 16 }
  0x3e   : > { %3265 = vmatmul.mubr.msk.bf16.vlgmr.msra.gmra.mrb[8].mxu1 %vm434_vm1, %v3881_v5  ;;  %v1293_v44 = vrot.slane %v1292_v28, 4  ;;  %v1302_v45 = vor.u32 %v1301_v30, %v1297_v16  ;;  %v643_v36 = vrot.slane %v642_v26, 4  ;;  %v1313_v17 = vshll.u32 %v1219_v15, 16  ;;  %v1224_v15 = vld [vmem:[%s3686_s19 + $0x38] sm:$0x1] }
  0x3f   : > { %3281 = vmatpush3.bf16.msra.mxu1 %v3697_v9  ;;  %v653_v53 = vrot.slane %v652_v12, 4  ;;  %v657_v21 = vrot.slane %v655_v3, 5  ;;  %v1312_v40 = vrot.slane %v1310_v7, 4  ;;  %v1319_v41 = vshll.u32 %v1220_v25, 16  ;;  %v376_v7 = vld [vmem:[%s3686_s19 + $0x44] sm:$0x1] }
  0x40   : > { %v1298_v43 = vsel %vm3739_vm4, %v1293_v44, %v1297_v16  ;;  %v1303_v49 = vrot.slane %v1302_v45, 4  ;;  %v648_v55 = vsel %vm3739_vm4, %v643_v36, %v3808_v51  ;;  %v1315_v57 = vrot.slane %v1313_v17, 5  ;;  %3489 = vmatprep.subr.msk.bf16.mxu1 %vm459_vm0, %v3893_v35  ;;  %v1225_v17 = vld [vmem:[%s3686_s19 + $0x3c] sm:$0xf] }
  0x41   : > { %v658_v9 = vsel %vm3739_vm4, %v653_v53, %v657_v21  ;;  %v1321_v50 = vrot.slane %v1319_v41, 5  ;;  %v1323_v61 = vshrl.u32 %v1220_v25, 16  ;;  %v1329_v1 = vshll.u32 %v1221_v37, 16 }
  0x42   : > { %v1308_v2 = vsel %vm3739_vm4, %v1303_v49, %v1307_v52  ;;  %v3913_v47 = vcombine.low %v648_v55, %v658_v9  ;;  %v1316_v14 = vor.u32 %v1315_v57, %v1312_v40  ;;  %v672_v51 = vsel %vm3739_vm4, %v3726_v48, %v3712_v33 }
  0x43   : > { %v3920_v23 = vcombine.low %v1298_v43, %v1308_v2  ;;  %v1325_v16 = vrot.slane %v1323_v61, 4  ;;  %v1331_v22 = vrot.slane %v1329_v1, 5  ;;  %v679_v28 = vshll.u32 %v373_v27, 16 }
  0x44   : > { %3215 = vmatmul.mubr.msk.bf16.gmra.mrb[4].mxu0 %vm434_vm1, %v3913_v47  ;;  %v1317_v30 = vrot.slane %v1316_v14, 4  ;;  %v1334_v26 = vshrl.u32 %v1222_v8, 16  ;;  %v1337_v25 = vshll.u32 %v1222_v8, 16  ;;  %v1343_v52 = vshll.u32 %v1223_v58, 16 }
  0x45   : > { %3268 = vmatprep.mubr.msk.bf16.mxu1 %vm434_vm1, %v3920_v23  ;;  %v1326_v12 = vor.u32 %v1325_v16, %v1321_v50  ;;  %v681_v33 = vrot.slane %v679_v28, 5  ;;  %v1347_v48 = vshrl.u32 %v1223_v58, 16  ;;  %v1353_v3 = vshll.u32 %v1224_v15, 16 }
  0x46   : > { %v1322_v44 = vsel %vm3739_vm4, %v1317_v30, %v1321_v50  ;;  %v1336_v45 = vrot.slane %v1334_v26, 4  ;;  %v1339_v36 = vrot.slane %v1337_v25, 5  ;;  %v1345_v37 = vrot.slane %v1343_v52, 5  ;;  %v1226_v50 = vld [vmem:[%s3686_s19 + $0x40] sm:$0xf] }
  0x47   : > { %v1327_v53 = vrot.slane %v1326_v12, 4  ;;  %v682_v21 = vsel %vm3739_vm4, %v3735_v56, %v681_v33  ;;  %v1349_v40 = vrot.slane %v1347_v48, 4  ;;  %v1355_v41 = vrot.slane %v1353_v3, 5  ;;  %v379_v12 = vld [vmem:[%s3686_s19 + $0x50] sm:$0x1] }
  0x48   : > { %v3933_v43 = vcombine.low %v672_v51, %v682_v21  ;;  %v1340_v49 = vor.u32 %v1339_v36, %v1336_v45  ;;  %v690_v55 = vor.u32 %v3754_v4, %v3746_v62  ;;  %v700_v57 = vor.u32 %v3762_v13, %v3756_v6  ;;  %v1227_v62 = vld [vmem:[%s3686_s19 + $0x44] sm:$0x1]  ;;  %v1228_v33 = vld [vmem:[%s3686_s19 + $0x48] sm:$0xf] }
  0x49   : > { %v1332_v27 = vsel %vm3739_vm4, %v1327_v53, %v1331_v22  ;;  %v1350_v8 = vor.u32 %v1349_v40, %v1345_v37  ;;  %v703_v9 = vshll.u32 %v376_v7, 16  ;;  %v1358_v61 = vshrl.u32 %v1225_v17, 16 }
  0x4a   : > { %v3942_v56 = vcombine.low %v1322_v44, %v1332_v27  ;;  %3218 = vmatprep.mubr.msk.bf16.mxu0 %vm434_vm1, %v3933_v43  ;;  %v1341_v1 = vrot.slane %v1340_v49, 4  ;;  %v691_v58 = vrot.slane %v690_v55, 4  ;;  %v701_v2 = vrot.slane %v700_v57, 4  ;;  %v1230_v27 = vld [vmem:[%s3686_s19 + $0x50] sm:$0x1] }
  0x4b   : > { %v1351_v4 = vrot.slane %v1350_v8, 4  ;;  %v705_v13 = vrot.slane %v703_v9, 5  ;;  %v1360_v14 = vrot.slane %v1358_v61, 4  ;;  %v1361_v51 = vshll.u32 %v1225_v17, 16 }
  0x4c   : > { %3269 = vmatmul.mubr.msk.bf16.gmra.mrb[12].mxu1 %vm434_vm1, %v3942_v56  ;;  %v1346_v15 = vsel %vm3739_vm4, %v1341_v1, %v1345_v37  ;;  %v696_v16 = vsel %vm3739_vm4, %v691_v58, %v3756_v6  ;;  %v1367_v22 = vshll.u32 %v1226_v50, 16  ;;  %v1371_v28 = vshrl.u32 %v1226_v50, 16  ;;  %v1229_v6 = vld [vmem:[%s3686_s19 + $0x4c] sm:$0xf] }
  0x4d   : > { %v1356_v30 = vsel %vm3739_vm4, %v1351_v4, %v1355_v41  ;;  %v706_v26 = vsel %vm3739_vm4, %v701_v2, %v705_v13  ;;  %v1363_v25 = vrot.slane %v1361_v51, 5  ;;  %v1377_v52 = vshll.u32 %v1227_v62, 16  ;;  %v382_v2 = vld [vmem:[%s3686_s19 + $0x5c] sm:$0x1]  ;;  %v1231_v51 = vld [vmem:[%s3686_s19 + $0x54] sm:$0xf] }
  0x4e   : > { %v3960_v48 = vcombine.low %v1346_v15, %v1356_v30  ;;  %v3962_v3 = vcombine.low %v696_v16, %v706_v26  ;;  %v1369_v7 = vrot.slane %v1367_v22, 5  ;;  %v1373_v44 = vrot.slane %v1371_v28, 4  ;;  %v1232_v28 = vld [vmem:[%s3686_s19 + $0x58] sm:$0xf] }
  0x4f   : > { %v1364_v45 = vor.u32 %v1363_v25, %v1360_v14  ;;  %v1379_v36 = vrot.slane %v1377_v52, 5  ;;  %v714_v37 = vor.u32 %v3791_v32, %v3789_v31  ;;  %v724_v17 = vor.u32 %v3796_v39, %v3794_v38 }
  0x50   : > { %3272 = vmatprep.mubr.msk.bf16.mxu1 %vm434_vm1, %v3960_v48  ;;  %3219 = vmatmul.mubr.msk.bf16.gmra.mrb[8].mxu0 %vm434_vm1, %v3962_v3  ;;  %v1374_v53 = vor.u32 %v1373_v44, %v1369_v7  ;;  %v727_v21 = vshll.u32 %v379_v12, 16  ;;  %v1382_v40 = vshrl.u32 %v1228_v33, 16  ;;  %v1385_v41 = vshll.u32 %v1228_v33, 16 }
  0x51   : > { %v1365_v49 = vrot.slane %v1364_v45, 4  ;;  %v715_v55 = vrot.slane %v714_v37, 4  ;;  %v725_v57 = vrot.slane %v724_v17, 4  ;;  %v1391_v31 = vshll.u32 %v1229_v6, 16 }
  0x52   : > { %v1375_v32 = vrot.slane %v1374_v53, 4  ;;  %v729_v8 = vrot.slane %v727_v21, 5  ;;  %v1384_v39 = vrot.slane %v1382_v40, 4  ;;  %v1387_v9 = vrot.slane %v1385_v41, 5 }
  0x53   : > { %v1370_v50 = vsel %vm3739_vm4, %v1365_v49, %v1369_v7  ;;  %v720_v61 = vsel %vm3739_vm4, %v715_v55, %v3794_v38  ;;  %v1393_v1 = vrot.slane %v1391_v31, 5  ;;  %v1395_v58 = vshrl.u32 %v1229_v6, 16  ;;  %v1233_v7 = vld [vmem:[%s3686_s19 + $0x5c] sm:$0x1] }
  0x54   : > { %v1380_v62 = vsel %vm3739_vm4, %v1375_v32, %v1379_v36  ;;  %v730_v4 = vsel %vm3739_vm4, %v725_v57, %v729_v8  ;;  %v1388_v13 = vor.u32 %v1387_v9, %v1384_v39  ;;  %v1401_v14 = vshll.u32 %v1230_v27, 16  ;;  %v1234_v9 = vld [vmem:[%s3686_s19 + $0x60] sm:$0xf] }
  0x55   : > { %v3985_v15 = vcombine.low %v1370_v50, %v1380_v62  ;;  %v3987_v16 = vcombine.low %v720_v61, %v730_v4  ;;  %v1397_v22 = vrot.slane %v1395_v58, 4  ;;  %v738_v38 = vor.u32 %v3822_v10, %v3815_v59 }
  0x56   : > { %v1389_v30 = vrot.slane %v1388_v13, 4  ;;  %v1403_v26 = vrot.slane %v1401_v14, 5  ;;  %v748_v25 = vor.u32 %v3827_v18, %v3824_v11  ;;  %v751_v52 = vshll.u32 %v382_v2, 16 }
  0x57   : > { %3273 = vmatmul.mubr.msk.bf16.gmra.mrb[16].mxu1 %vm434_vm1, %v3985_v15  ;;  %3222 = vmatprep.mubr.msk.bf16.mxu0 %vm434_vm1, %v3987_v16  ;;  %v1398_v12 = vor.u32 %v1397_v22, %v1393_v1  ;;  %v739_v33 = vrot.slane %v738_v38, 4  ;;  %v1406_v44 = vshrl.u32 %v1231_v51, 16  ;;  %v1409_v6 = vshll.u32 %v1231_v51, 16  ;;  %v3089_v51 = vld [vmem:[%s4742_s1 + $0x8] sm:$0x3] }
  0x58   : > { %v1394_v59 = vsel %vm3739_vm4, %v1389_v30, %v1393_v1  ;;  %v749_v10 = vrot.slane %v748_v25, 4  ;;  %v753_v45 = vrot.slane %v751_v52, 5  ;;  %v1415_v36 = vshll.u32 %v1232_v28, 16  ;;  %v1235_v1 = vld [vmem:[%s3686_s19 + $0x64] sm:$0xf] }
  0x59   : > { %v1399_v37 = vrot.slane %v1398_v12, 4  ;;  %v744_v18 = vsel %vm3739_vm4, %v739_v33, %v3824_v11  ;;  %v1408_v17 = vrot.slane %v1406_v44, 4  ;;  %v1411_v53 = vrot.slane %v1409_v6, 5  ;;  %v1236_v30 = vld [vmem:[%s3686_s19 + $0x68] sm:$0x1] }
  0x5a   : > { %v754_v21 = vsel %vm3739_vm4, %v749_v10, %v753_v45  ;;  %v1417_v40 = vrot.slane %v1415_v36, 5  ;;  %v1419_v41 = vshrl.u32 %v1232_v28, 16  ;;  %v1425_v49 = vshll.u32 %v1233_v7, 16  ;;  %v4072_v45 = vld [vmem:[%s3686_s19 + $0x10] sm:$0xf] }
  0x5b   : > { %v1404_v55 = vsel %vm3739_vm4, %v1399_v37, %v1403_v26  ;;  %v4008_v57 = vcombine.low %v744_v18, %v754_v21  ;;  %v1412_v27 = vor.u32 %v1411_v53, %v1408_v17  ;;  %v1580_v2 = vshrl.u32 %v1234_v9, 16  ;;  %v4044_v26 = vld [vmem:[%s3686_s19 + $0x60] sm:$0xf]  ;;  %v4087_v21 = vld [vmem:[%s3686_s19 + $0x18] sm:$0xf] }
  0x5c   : > { %v4010_v31 = vcombine.low %v1394_v59, %v1404_v55  ;;  %v1421_v32 = vrot.slane %v1419_v41, 4  ;;  %v1427_v39 = vrot.slane %v1425_v49, 5  ;;  %v1583_v62 = vshll.u32 %v1234_v9, 16  ;;  %v4060_v59 = vld [vmem:[%s3686_s19 + $0xc] sm:$0xf] }
  0x5d   : > { %3223 = vmatmul.mubr.msk.bf16.gmra.mrb[12].mxu0 %vm434_vm1, %v4008_v57  ;;  %v1413_v11 = vrot.slane %v1412_v27, 4  ;;  %v1079_v13 = vsel %vm459_vm0, %v3854_v42, 0  ;;  %v1589_v14 = vshll.u32 %v1235_v1, 16  ;;  %v1582_v22 = vrot.slane %v1580_v2, 4 }
  0x5e   : > { %3276 = vmatprep.mubr.msk.bf16.mxu1 %vm434_vm1, %v4010_v31  ;;  %v1422_v8 = vor.u32 %v1421_v32, %v1417_v40  ;;  %3228 = vmatprep.mubr.msk.bf16.mxu0 %vm434_vm1, %v3714_v34  ;;  %v1593_v34 = vshrl.u32 %v1235_v1, 16  ;;  %v1585_v38 = vrot.slane %v1583_v62, 5  ;;  %v1048_v25 = vshrl.u32 %v4044_v26, 16  ;;  %v4121_v62 = vld [vmem:[%s3686_s19 + $0x28] sm:$0xf] }
  0x5f   : > { %v1418_v50 = vsel %vm3739_vm4, %v1413_v11, %v1417_v40  ;;  %v4039_v42 = vrot.slane %v1589_v14, 5  ;;  %v1834_v12 = vsel %vm459_vm0, %v3893_v35, 0  ;;  %v1599_v7 = vshll.u32 %v1236_v30, 16 }
  0x60   : > { %v1423_v61 = vrot.slane %v1422_v8, 4  ;;  %v1595_v28 = vrot.slane %v1593_v34, 4  ;;  %v1586_v52 = vor.u32 %v1585_v38, %v1582_v22  ;;  %v1934_v36 = vshrl.u32 %v4060_v59, 16  ;;  %v4132_v38 = vld [vmem:[%s3686_s19 + $0x30] sm:$0xf] }
  0x61   : > { %v1937_v37 = vshll.u32 %v4060_v59, 16  ;;  %v4077_v18 = vsel %vm459_vm0, %v3089_v51, 0  ;;  %v1943_v53 = vshll.u32 %v4072_v45, 16  ;;  %v1601_v41 = vrot.slane %v1599_v7, 5  ;;  %v4154_v7 = vld [vmem:[%s3686_s19 + $0x3c] sm:$0xf] }
  0x62   : > { %v1428_v58 = vsel %vm3739_vm4, %v1423_v61, %v1427_v39  ;;  %v1596_v33 = vor.u32 %v1595_v28, %v4039_v42  ;;  %v1587_v17 = vrot.slane %v1586_v52, 4  ;;  %v1947_v49 = vshrl.u32 %v4072_v45, 16  ;;  %v4111_v61 = vld [vmem:[%s3686_s19 + $0x24] sm:$0xf] }
  0x63   : > { %v4024_v4 = vcombine.low %v1418_v50, %v1428_v58  ;;  %v1958_v55 = vshrl.u32 %v4087_v21, 16  ;;  %v1961_v11 = vshll.u32 %v4087_v21, 16  ;;  %v4105_v39 = vrot.slane %v1934_v36, 4  ;;  %v4167_v36 = vld [vmem:[%s3686_s19 + $0x40] sm:$0xf] }
  0x64   : > { %v1597_v40 = vrot.slane %v1596_v33, 4  ;;  %v4107_v9 = vrot.slane %v1937_v37, 5  ;;  %v1592_v1 = vsel %vm3739_vm4, %v1587_v17, %v4039_v42  ;;  %v4116_v58 = vrot.slane %v1943_v53, 5 }
  0x65   : > { %3277 = vmatmul.mubr.msk.bf16.gmra.mrb[20].mxu1 %vm434_vm1, %v4024_v4  ;;  %3229 = vmatmul.mubr.msk.bf16.vlgmr.msra.gmra.mrb[0].mxu0 %vm434_vm1, %v3748_v0  ;;  %v3072_v0 = vld [vmem:[%s4742_s1 + $0x6] sm:$0x3]  ;;  %v4126_v34 = vrot.slane %v1947_v49, 4  ;;  %v1985_v22 = vshll.u32 %v4111_v61, 16  ;;  %v4134_v42 = vrot.slane %v1961_v11, 5  ;;  %v1991_v30 = vshll.u32 %v4121_v62, 16 }
  0x66   : > { %3282 = vmatprep.mubr.msk.bf16.mxu1 %vm434_vm1, %v3881_v5  ;;  %3245 = vmatpush3.bf16.msra.mxu0 %v1079_v13  ;;  %v4050_v5 = vld [vmem:[%s3686_s19 + $0x64] sm:$0xf]  ;;  %v4063_v10 = vsel %vm459_vm0, %v3072_v0, 0  ;;  %v1982_v13 = vshrl.u32 %v4111_v61, 16  ;;  %v1602_v14 = vsel %vm3739_vm4, %v1597_v40, %v1601_v41  ;;  %v2009_v33 = vshll.u32 %v4132_v38, 16 }
  0x67   : > { %3232 = vmatprep.mubr.msk.bf16.mxu0 %vm434_vm1, %v3786_v29  ;;  %3491 = vmatprep.subr.msk.bf16.mxu0 %vm459_vm0, %v3089_v51  ;;  %v1051_v29 = vshll.u32 %v4044_v26, 16  ;;  %v1057_v44 = vshll.u32 %v4050_v5, 16  ;;  %v1061_v6 = vshrl.u32 %v4050_v5, 16  ;;  %v4128_v51 = vrot.slane %v1958_v55, 4  ;;  %v4185_v11 = vld [vmem:[%s3686_s19 + $0x4c] sm:$0xf] }
  0x68   : > { %v4169_v37 = vrot.slane %v1985_v22, 5  ;;  %v2030_v17 = vshrl.u32 %v4154_v7, 16  ;;  %v2039_v53 = vshll.u32 %v4167_v36, 16  ;;  %v4177_v40 = vrot.slane %v1991_v30, 5 }
  0x69   : > { %v4097_v27 = vrot.slane %v1057_v44, 5  ;;  %v4099_v32 = vrot.slane %v1061_v6, 4  ;;  %v2043_v55 = vshrl.u32 %v4167_v36, 16  ;;  %v2063_v49 = vshll.u32 %v4185_v11, 16 }
  0x6b   : > { %v4215_v8 = vrot.slane %v2043_v55, 4 }
  0x6d   : > { %3283 = vmatmul.mubr.msk.bf16.vlgmr.msra.gmra.mrb[8].mxu1 %vm434_vm1, %v3920_v23  ;;  %3233 = vmatmul.mubr.msk.bf16.gmra.mrb[4].mxu0 %vm434_vm1, %v3703_v19  ;;  %v4081_v23 = vrot.slane %v1048_v25, 4  ;;  %v4083_v19 = vrot.slane %v1051_v29, 5  ;;  %v4141_v25 = vld [vmem:[%s3686_s19 + $0x34] sm:$0xf]  ;;  %4759 = vst [vmem:[#allocation7_spill] sm:$0xff] %v4215_v8 }
  0x6e   : > { %3299 = vmatpush3.bf16.msra.mxu1 %v1834_v12  ;;  %3286 = vmatprep.mubr.msk.bf16.mxu1 %vm434_vm1, %v3942_v56  ;;  %v4094_v56 = vld [vmem:[%s3686_s19 + $0x1c] sm:$0xf]  ;;  %v2006_v12 = vshrl.u32 %v4132_v38, 16  ;;  %v2015_v44 = vshll.u32 %v4141_v25, 16  ;;  %v2019_v6 = vshrl.u32 %v4141_v25, 16 }
  0x6f   : > { %3236 = vmatprep.mubr.msk.bf16.mxu0 %vm434_vm1, %v3732_v54  ;;  %3490 = vmatprep.subr.msk.bf16.mxu1 %vm459_vm0, %v3072_v0  ;;  %v1967_v54 = vshll.u32 %v4094_v56, 16  ;;  %v1971_v50 = vshrl.u32 %v4094_v56, 16  ;;  %v1995_v0 = vshrl.u32 %v4121_v62, 16  ;;  %v385_v8 = vld [vmem:[%s3686_s19 + $0x68] sm:$0x1] }
  0x70   : > { %v4197_v22 = vrot.slane %v2015_v44, 5  ;;  %v4199_v30 = vrot.slane %v2019_v6, 4  ;;  %v2307_v44 = vld [vmem:[%s3686_s19 + $0xc] sm:$0xf]  ;;  %v2067_v6 = vshrl.u32 %v4185_v11, 16 }
  0x71   : > { %v4136_v28 = vrot.slane %v1967_v54, 5  ;;  %v4147_v29 = vrot.slane %v1971_v50, 4  ;;  %v4179_v41 = vrot.slane %v1995_v0, 4  ;;  %v4187_v54 = vrot.slane %v2006_v12, 4  ;;  %v4204_v12 = vld [vmem:[%s3686_s19 + $0x58] sm:$0xf] }
  0x72   : > { %v4189_v50 = vrot.slane %v2009_v33, 5  ;;  %4754 = vst [vmem:[#allocation2_spill] sm:$0xff] %v4199_v30  ;;  %4755 = vst [vmem:[#allocation3_spill] sm:$0xff] %v4204_v12  ;;  %v4206_v33 = vrot.slane %v2030_v17, 4  ;;  %v2308_v17 = vld [vmem:[%s3686_s19 + $0x10] sm:$0xf] }
  0x73   : > { %v2087_v55 = vshll.u32 %v4204_v12, 16  ;;  %v2091_v2 = vshrl.u32 %v4204_v12, 16 }
  0x74   : > { %4756 = vst [vmem:[#allocation4_spill] sm:$0xff] %v4206_v33  ;;  %v1745_v33 = vld [vmem:[%s3686_s19 + $0x14] sm:$0x1] }
  0x75   : > { %3287 = vmatmul.mubr.msk.bf16.gmra.mrb[12].mxu1 %vm434_vm1, %v3960_v48  ;;  %3237 = vmatmul.mubr.msk.bf16.gmra.mrb[8].mxu0 %vm434_vm1, %v3775_v20  ;;  %v4160_v20 = vcombine.low %v1592_v1, %v1602_v14  ;;  %v4162_v48 = vrot.slane %v1982_v13, 4  ;;  %v4195_v14 = vld [vmem:[%s3686_s19 + $0x54] sm:$0xf]  ;;  %v4210_v1 = vrot.slane %v2039_v53, 5 }
  0x76   : > { %3290 = vmatprep.mubr.msk.bf16.mxu1 %vm434_vm1, %v3985_v15  ;;  %3240 = vmatprep.mubr.msk.bf16.mxu0 %vm434_vm1, %v3805_v46  ;;  %v2033_v15 = vshll.u32 %v4154_v7, 16  ;;  %v4175_v46 = vld [vmem:[%s3686_s19 + $0x48] sm:$0xf]  ;;  %v2078_v35 = vshrl.u32 %v4195_v14, 16  ;;  %v2081_v30 = vshll.u32 %v4195_v14, 16 }
  0x77   : > { %v2054_v13 = vshrl.u32 %v4175_v46, 16  ;;  %v2057_v0 = vshll.u32 %v4175_v46, 16  ;;  %4758 = vst [vmem:[#allocation6_spill] sm:$0xff] %v4210_v1  ;;  %v1054_v1 = vor.u32 %v4083_v19, %v4081_v23  ;;  %v4250_v23 = vld [vmem:[%s3686_s19 + $0x64] sm:$0xf]  ;;  %v2335_v19 = vshll.u32 %v2307_v44, 16 }
  0x78   : > { %v4208_v52 = vrot.slane %v2033_v15, 5  ;;  %v4760_v15 = vcombine.low %v4044_v26, %v4050_v5  ;;  %v4240_v26 = vrot.slane %v2063_v49, 5  ;;  %v4254_v49 = vrot.slane %v2078_v35, 4 }
  0x79   : > { %v4227_v53 = vrot.slane %v2054_v13, 4  ;;  %v1064_v13 = vor.u32 %v4099_v32, %v4097_v27  ;;  %v1067_v5 = vshll.u32 %v385_v8, 16  ;;  %v4260_v32 = vrot.slane %v2091_v2, 4 }
  0x7a   : > { %4757 = vst [vmem:[#allocation5_spill] sm:$0xff] %v4208_v52  ;;  %4763 = vst [vmem:[#allocation10_spill] sm:$0xff] %v4240_v26  ;;  %v4256_v26 = vrot.slane %v2081_v30, 5  ;;  %v4262_v52 = vrot.slane %v1054_v1, 4  ;;  %v1940_v8 = vor.u32 %v4107_v9, %v4105_v39  ;;  %v1950_v9 = vor.u32 %v4126_v34, %v4116_v58 }
  0x7b   : > { %4761 = vst [vmem:[#allocation8_spill] sm:$0xff] %v4227_v53  ;;  %v2341_v53 = vshll.u32 %v2308_v17, 16  ;;  %4765 = vst [vmem:[#allocation12_spill] sm:$0xff] %v4254_v49  ;;  %v4278_v49 = vrot.slane %v1067_v5, 5 }
  0x7c   : > { %4766 = vst [vmem:[#allocation13_spill] sm:$0xff] %v4256_v26  ;;  %4768 = vst [vmem:[#allocation15_spill] sm:$0xff] %v4260_v32  ;;  %v2337_v32 = vrot.slane %v2335_v19, 5  ;;  %v1748_v26 = vld [vmem:[%s3686_s19 + $0x20] sm:$0x1]  ;;  %v1953_v19 = vshll.u32 %v1745_v33, 16 }
  0x7d   : > { %3291 = vmatmul.mubr.msk.bf16.gmra.mrb[16].mxu1 %vm434_vm1, %v4010_v31  ;;  %3241 = vmatmul.mubr.msk.bf16.gmra.mrb[12].mxu0 %vm434_vm1, %v4760_v15  ;;  %v4238_v31 = vrot.slane %v2057_v0, 5  ;;  %v4247_v15 = vld [vmem:[%s3686_s19 + $0x60] sm:$0xf]  ;;  %v4252_v0 = vrot.slane %v2067_v6, 4  ;;  %v4268_v6 = vrot.slane %v1064_v13, 4  ;;  %v4275_v1 = vrot.slane %v2341_v53, 5 }
  0x7e   : > { %3294 = vmatprep.mubr.msk.bf16.mxu1 %vm434_vm1, %v4024_v4  ;;  %3246 = vmatprep.mubr.msk.bf16.mxu0 %vm434_vm1, %v3844_v24  ;;  %v2332_v4 = vshrl.u32 %v2307_v44, 16  ;;  %v2345_v24 = vshrl.u32 %v2308_v17, 16  ;;  %v2310_v17 = vld [vmem:[%s3686_s19 + $0x18] sm:$0xf]  ;;  %v2102_v35 = vshrl.u32 %v4247_v15, 16  ;;  %v2105_v30 = vshll.u32 %v4247_v15, 16 }
  0x7f   : > { %4762 = vst [vmem:[#allocation9_spill] sm:$0xff] %v4238_v31  ;;  %4764 = vst [vmem:[#allocation11_spill] sm:$0xff] %v4252_v0  ;;  %v4258_v31 = vrot.slane %v2087_v55, 5  ;;  %v2311_v55 = vld [vmem:[%s3686_s19 + $0x1c] sm:$0xf]  ;;  %v2111_v44 = vshll.u32 %v4250_v23, 16 }
  0x80   : > { %v2334_v2 = vrot.slane %v2332_v4, 4  ;;  %v2309_v13 = vld [vmem:[%s3686_s19 + $0x14] sm:$0x1]  ;;  %v2356_v0 = vshrl.u32 %v2310_v17, 16  ;;  %v2359_v12 = vshll.u32 %v2310_v17, 16  ;;  %v2365_v53 = vshll.u32 %v2311_v55, 16 }
  0x81   : > { %4767 = vst [vmem:[#allocation14_spill] sm:$0xff] %v4258_v31  ;;  %v2347_v31 = vrot.slane %v2345_v24, 4  ;;  %v2369_v5 = vshrl.u32 %v2311_v55, 16  ;;  %v4769_v4 = vcombine.low %v4060_v59, %v4072_v45  ;;  %v1977_v24 = vshll.u32 %v1748_v26, 16 }
  0x82   : > { %v1941_v34 = vrot.slane %v1940_v8, 4  ;;  %v2338_v17 = vor.u32 %v2337_v32, %v2334_v2  ;;  %v2351_v45 = vshll.u32 %v2309_v13, 16  ;;  %v2361_v33 = vrot.slane %v2359_v12, 5  ;;  %v2313_v8 = vld [vmem:[%s3686_s19 + $0x24] sm:$0xf] }
  0x83   : > { %v2348_v59 = vor.u32 %v2347_v31, %v4275_v1  ;;  %v1951_v26 = vrot.slane %v1950_v9, 4  ;;  %v4312_v31 = vrot.slane %v2365_v53, 5  ;;  %v2371_v32 = vrot.slane %v2369_v5, 4 }
  0x84   : > { %v1955_v55 = vrot.slane %v1953_v19, 5  ;;  %v1946_v12 = vsel %vm3739_vm4, %v1941_v34, %v4116_v58  ;;  %v2380_v9 = vshrl.u32 %v2313_v8, 16  ;;  %v2383_v53 = vshll.u32 %v2313_v8, 16  ;;  %v2315_v8 = vld [vmem:[%s3686_s19 + $0x2c] sm:$0x1] }
  0x85   : > { %3295 = vmatmul.mubr.msk.bf16.gmra.mrb[20].mxu1 %vm434_vm1, %v4160_v20  ;;  %3247 = vmatmul.mubr.msk.bf16.vlgmr.msra.gmra.mrb[0].mxu0 %vm434_vm1, %v3879_v63  ;;  %v1964_v20 = vor.u32 %v4134_v42, %v4128_v51  ;;  %v1974_v63 = vor.u32 %v4147_v29, %v4136_v28  ;;  %v4305_v51 = vrot.slane %v2102_v35, 4  ;;  %v2312_v42 = vld [vmem:[%s3686_s19 + $0x20] sm:$0x1]  ;;  %v2358_v29 = vrot.slane %v2356_v0, 4 }
  0x86   : > { %3300 = vmatprep.mubr.msk.bf16.mxu1 %vm434_vm1, %v4769_v4  ;;  %3335 = vmatpush3.bf16.msra.mxu0 %v4077_v18  ;;  %v1060_v18 = vsel %vm3739_vm4, %v4262_v52, %v4097_v27  ;;  %v1979_v27 = vrot.slane %v1977_v24, 5  ;;  %v1751_v52 = vld [vmem:[%s3686_s19 + $0x2c] sm:$0x1]  ;;  %v2339_v0 = vrot.slane %v2338_v17, 4  ;;  %v2349_v35 = vrot.slane %v2348_v59, 4 }
  0x87   : > { %3250 = vmatprep.mubr.msk.bf16.mxu0 %vm434_vm1, %v3913_v47  ;;  %v1070_v47 = vsel %vm3739_vm4, %v4268_v6, %v4278_v49  ;;  %v1965_v2 = vrot.slane %v1964_v20, 4  ;;  %v1975_v13 = vrot.slane %v1974_v63, 4  ;;  %v2353_v4 = vrot.slane %v2351_v45, 5  ;;  %v2314_v6 = vld [vmem:[%s3686_s19 + $0x28] sm:$0xf] }
  0x88   : > { %v2362_v39 = vor.u32 %v2361_v33, %v2358_v29  ;;  %v2375_v49 = vshll.u32 %v2312_v42, 16  ;;  %v4770_v5 = vcombine.low %v4087_v21, %v4094_v56  ;;  %v2372_v19 = vor.u32 %v2371_v32, %v4312_v31  ;;  %v2316_v17 = vld [vmem:[%s3686_s19 + $0x30] sm:$0xf]  ;;  %v2317_v29 = vld [vmem:[%s3686_s19 + $0x34] sm:$0xf] }
  0x89   : > { %v1988_v58 = vor.u32 %v4169_v37, %v4162_v48  ;;  %v1998_v20 = vor.u32 %v4179_v41, %v4177_v40  ;;  %v2001_v63 = vshll.u32 %v1751_v52, 16  ;;  %v4771_v21 = vcombine.low %v4111_v61, %v4121_v62  ;;  %v2320_v52 = vld [vmem:[%s3686_s19 + $0x40] sm:$0xf] }
  0x8a   : > { %v4336_v56 = vrot.slane %v2105_v30, 5  ;;  %v1970_v48 = vsel %vm3739_vm4, %v1965_v2, %v4136_v28  ;;  %v1980_v37 = vsel %vm3739_vm4, %v1975_v13, %v1979_v27  ;;  %v2354_v61 = vsel %vm3739_vm4, %v2349_v35, %v2353_v4 }
  0x8b   : > { %v2389_v62 = vshll.u32 %v2314_v6, 16  ;;  %v2393_v41 = vshrl.u32 %v2314_v6, 16  ;;  %v2363_v30 = vrot.slane %v2362_v39, 4  ;;  %v2377_v28 = vrot.slane %v2375_v49, 5 }
  0x8c   : > { %v2382_v24 = vrot.slane %v2380_v9, 4  ;;  %v2385_v34 = vrot.slane %v2383_v53, 5  ;;  %v2373_v59 = vrot.slane %v2372_v19, 4  ;;  %v1989_v45 = vrot.slane %v1988_v58, 4 }
  0x8d   : > { %3301 = vmatmul.mubr.msk.bf16.vlgmr.msra.gmra.mrb[24].mxu1 %vm434_vm1, %v4770_v5  ;;  %3251 = vmatmul.mubr.msk.bf16.gmra.mrb[4].mxu0 %vm434_vm1, %v3933_v43  ;;  %v1956_v43 = vsel %vm3739_vm4, %v1951_v26, %v1955_v55  ;;  %v2003_v42 = vrot.slane %v2001_v63, 5  ;;  %v3019_v33 = vcombine.low %v1060_v18, %v1070_v47  ;;  %v4358_v32 = vcombine.low %v1970_v48, %v1980_v37  ;;  %v2319_v55 = vld [vmem:[%s3686_s19 + $0x3c] sm:$0xf] }
  0x8e   : > { %3317 = vmatpush3.bf16.msra.mxu1 %v4063_v10  ;;  %3304 = vmatprep.mubr.msk.bf16.mxu1 %vm434_vm1, %v4771_v21  ;;  %v2344_v10 = vsel %vm3739_vm4, %v2339_v0, %v4275_v1  ;;  %v4354_v1 = vcombine.low %v1946_v12, %v1956_v43  ;;  %v4362_v39 = vrot.slane %v2389_v62, 5  ;;  %v2395_v2 = vrot.slane %v2393_v41, 4  ;;  %v2318_v21 = vld [vmem:[%s3686_s19 + $0x38] sm:$0x1] }
  0x8f   : > { %3254 = vmatprep.mubr.msk.bf16.mxu0 %vm434_vm1, %v3962_v3  ;;  %v1999_v3 = vrot.slane %v1998_v20, 4  ;;  %v4356_v26 = vcombine.low %v2344_v10, %v2354_v61  ;;  %v2404_v13 = vshrl.u32 %v2316_v17, 16  ;;  %v2407_v27 = vshll.u32 %v2316_v17, 16 }
  0x90   : > { %v2368_v0 = vsel %vm3739_vm4, %v2363_v30, %v4312_v31  ;;  %v2386_v18 = vor.u32 %v2385_v34, %v2382_v24  ;;  %v2413_v47 = vshll.u32 %v2317_v29, 16  ;;  %v2417_v12 = vshrl.u32 %v2317_v29, 16 }
  0x91   : > { %v4772_v35 = vcombine.low %v4132_v38, %v4141_v25  ;;  %v2378_v4 = vsel %vm3739_vm4, %v2373_v59, %v2377_v28  ;;  %v1994_v49 = vsel %vm3739_vm4, %v1989_v45, %v4177_v40  ;;  %v2004_v31 = vsel %vm3739_vm4, %v1999_v3, %v2003_v42  ;;  %v2323_v28 = vld [vmem:[%s3686_s19 + $0x4c] sm:$0xf]  ;;  %v2321_v45 = vld [vmem:[%s3686_s19 + $0x44] sm:$0x1] }
  0x92   : > { %v2399_v6 = vshll.u32 %v2315_v8, 16  ;;  %v4773_v38 = vcombine.low %v4154_v7, %v4167_v36  ;;  %v2428_v25 = vshrl.u32 %v2319_v55, 16  ;;  %v2431_v9 = vshll.u32 %v2319_v55, 16  ;;  %v4774_v36 = vld [vmem:[#allocation2_spill] sm:$0xff]  ;;  %v2325_v55 = vld [vmem:[%s3686_s19 + $0x54] sm:$0xf] }
  0x93   : > { %v2437_v53 = vshll.u32 %v2320_v52, 16  ;;  %v2441_v5 = vshrl.u32 %v2320_v52, 16  ;;  %v2396_v40 = vor.u32 %v2395_v2, %v4362_v39  ;;  %v2012_v19 = vor.u32 %v4189_v50, %v4187_v54  ;;  %v2322_v54 = vld [vmem:[%s3686_s19 + $0x48] sm:$0xf] }
  0x94   : > { %v2406_v58 = vrot.slane %v2404_v13, 4  ;;  %v2409_v20 = vrot.slane %v2407_v27, 5  ;;  %v2387_v7 = vrot.slane %v2386_v18, 4  ;;  %v2022_v63 = vor.u32 %v4774_v36, %v4197_v22  ;;  %v4776_v18 = vld [vmem:[#allocation3_spill] sm:$0xff] }
  0x95   : > { %3305 = vmatmul.mubr.msk.bf16.gmra.mrb[28].mxu1 %vm434_vm1, %v4772_v35  ;;  %3255 = vmatmul.mubr.msk.bf16.gmra.mrb[8].mxu0 %vm434_vm1, %v3987_v16  ;;  %v1754_v16 = vld [vmem:[%s3686_s19 + $0x38] sm:$0x1]  ;;  %v2419_v43 = vrot.slane %v2417_v12, 4  ;;  %v4396_v48 = vcombine.low %v2368_v0, %v2378_v4  ;;  %v4398_v37 = vcombine.low %v1994_v49, %v2004_v31  ;;  %v2401_v10 = vrot.slane %v2399_v6, 5 }
  0x96   : > { %3308 = vmatprep.mubr.msk.bf16.mxu1 %vm434_vm1, %v4773_v38  ;;  %3258 = vmatprep.mubr.msk.bf16.mxu0 %vm434_vm1, %v4008_v57  ;;  %v4394_v57 = vrot.slane %v2413_v47, 5  ;;  %v2025_v61 = vshll.u32 %v1754_v16, 16  ;;  %v2430_v50 = vrot.slane %v2428_v25, 4  ;;  %v2433_v62 = vrot.slane %v2431_v9, 5 }
  0x97   : > { %v4401_v41 = vrot.slane %v2437_v53, 5  ;;  %v2443_v30 = vrot.slane %v2441_v5, 4  ;;  %v2397_v24 = vrot.slane %v2396_v40, 4  ;;  %v4404_v34 = vrot.slane %v2012_v19, 4 }
  0x98   : > { %v2410_v17 = vor.u32 %v2409_v20, %v2406_v58  ;;  %v2423_v59 = vshll.u32 %v2318_v21, 16  ;;  %v2392_v3 = vsel %vm3739_vm4, %v2387_v7, %v4362_v39  ;;  %v4410_v42 = vrot.slane %v2022_v63, 4  ;;  %v2326_v39 = vld [vmem:[%s3686_s19 + $0x58] sm:$0xf]  ;;  %v2324_v63 = vld [vmem:[%s3686_s19 + $0x50] sm:$0x1] }
  0x99   : > { %v2420_v29 = vor.u32 %v2419_v43, %v4394_v57  ;;  %v2452_v8 = vshrl.u32 %v2322_v54, 16  ;;  %v4775_v2 = vcombine.low %v4175_v46, %v4185_v11  ;;  %v4419_v13 = vrot.slane %v2025_v61, 5  ;;  %v4778_v46 = vld [vmem:[#allocation4_spill] sm:$0xff]  ;;  %v4779_v11 = vld [vmem:[#allocation5_spill] sm:$0xff] }
  0x9a   : > { %v2455_v27 = vshll.u32 %v2322_v54, 16  ;;  %v2461_v52 = vshll.u32 %v2323_v28, 16  ;;  %v2465_v0 = vshrl.u32 %v2323_v28, 16  ;;  %v4777_v47 = vcombine.low %v4195_v14, %v4776_v18  ;;  %v2328_v54 = vld [vmem:[%s3686_s19 + $0x60] sm:$0xf]  ;;  %v4781_v28 = vld [vmem:[#allocation7_spill] sm:$0xff] }
  0x9b   : > { %v2036_v12 = vor.u32 %v4779_v11, %v4778_v46  ;;  %v2434_v35 = vor.u32 %v2433_v62, %v2430_v50  ;;  %v2447_v4 = vshll.u32 %v2321_v45, 16  ;;  %v2402_v49 = vsel %vm3739_vm4, %v2397_v24, %v2401_v10  ;;  %v2329_v45 = vld [vmem:[%s3686_s19 + $0x64] sm:$0xf] }
  0x9c   : > { %v2411_v31 = vrot.slane %v2410_v17, 4  ;;  %v2425_v6 = vrot.slane %v2423_v59, 5  ;;  %v2476_v38 = vshrl.u32 %v2325_v55, 16  ;;  %v2421_v14 = vrot.slane %v2420_v29, 4  ;;  %v2327_v59 = vld [vmem:[%s3686_s19 + $0x5c] sm:$0x1] }
  0x9d   : > { %3309 = vmatmul.mubr.msk.bf16.gmra.mrb[32].mxu1 %vm434_vm1, %v4775_v2  ;;  %3259 = vmatmul.mubr.msk.bf16.gmra.mrb[12].mxu0 %vm434_vm1, %v3019_v33  ;;  %v2444_v33 = vor.u32 %v2443_v30, %v4401_v41  ;;  %v2454_v16 = vrot.slane %v2452_v8, 4  ;;  %v2479_v25 = vshll.u32 %v2325_v55, 16  ;;  %v2485_v9 = vshll.u32 %v2326_v39, 16  ;;  %v4780_v30 = vld [vmem:[#allocation6_spill] sm:$0xff] }
  0x9e   : > { %3312 = vmatprep.mubr.msk.bf16.mxu1 %vm434_vm1, %v4777_v47  ;;  %3336 = vmatprep.mubr.msk.bf16.mxu0 %vm434_vm1, %v4356_v26  ;;  %v1757_v26 = vld [vmem:[%s3686_s19 + $0x44] sm:$0x1]  ;;  %v2457_v53 = vrot.slane %v2455_v27, 5  ;;  %v4434_v5 = vrot.slane %v2461_v52, 5  ;;  %v2467_v40 = vrot.slane %v2465_v0, 4  ;;  %v2489_v19 = vshrl.u32 %v2326_v39, 16 }
  0x9f   : > { %v3092_v58 = vcombine.low %v2392_v3, %v2402_v49  ;;  %v2435_v20 = vrot.slane %v2434_v35, 4  ;;  %v2445_v7 = vrot.slane %v2444_v33, 4  ;;  %v2449_v36 = vrot.slane %v2447_v4, 5  ;;  %v1760_v35 = vld [vmem:[%s3686_s19 + $0x50] sm:$0x1] }
  0xa0   : > { %v2478_v21 = vrot.slane %v2476_v38, 4  ;;  %v2481_v43 = vrot.slane %v2479_v25, 5  ;;  %v4437_v10 = vrot.slane %v2485_v9, 5  ;;  %v2491_v61 = vrot.slane %v2489_v19, 4  ;;  %v1763_v49 = vld [vmem:[%s3686_s19 + $0x5c] sm:$0x1] }
  0xa1   : > { %v2416_v50 = vsel %vm3739_vm4, %v2411_v31, %v4394_v57  ;;  %v4443_v62 = vrot.slane %v2036_v12, 4  ;;  %v2046_v24 = vor.u32 %v4781_v28, %v4780_v30  ;;  %v2049_v17 = vshll.u32 %v1757_v26, 16  ;;  %v4789_v28 = vld [vmem:[#allocation14_spill] sm:$0xff] }
  0xa2   : > { %v4782_v3 = vcombine.low %v4247_v15, %v4250_v23  ;;  %v2426_v29 = vsel %vm3739_vm4, %v2421_v14, %v2425_v6  ;;  %v2458_v57 = vor.u32 %v2457_v53, %v2454_v16  ;;  %v2468_v8 = vor.u32 %v2467_v40, %v4434_v5  ;;  %v2330_v53 = vld [vmem:[%s3686_s19 + $0x68] sm:$0x1] }
  0xa3   : > { %v2471_v55 = vshll.u32 %v2324_v63, 16  ;;  %v2440_v15 = vsel %vm3739_vm4, %v2435_v20, %v4401_v41  ;;  %v2500_v2 = vshrl.u32 %v2328_v54, 16  ;;  %v2503_v27 = vshll.u32 %v2328_v54, 16  ;;  %v4783_v20 = vld [vmem:[#allocation8_spill] sm:$0xff] }
  0xa4   : > { %v2482_v52 = vor.u32 %v2481_v43, %v2478_v21  ;;  %v2492_v0 = vor.u32 %v2491_v61, %v4437_v10  ;;  %v2495_v39 = vshll.u32 %v2327_v59, 16  ;;  %v2509_v18 = vshll.u32 %v2329_v45, 16 }
  0xa5   : > { %3313 = vmatmul.mubr.msk.bf16.gmra.mrb[36].mxu1 %vm434_vm1, %v4782_v3  ;;  %3337 = vmatmul.mubr.msk.bf16.vlgmr.msra.gmra.mrb[16].mxu0 %vm434_vm1, %v4396_v48  ;;  %v2450_v48 = vsel %vm3739_vm4, %v2445_v7, %v2449_v36  ;;  %v3093_v47 = vcombine.low %v2416_v50, %v2426_v29  ;;  %v2047_v46 = vrot.slane %v2046_v24, 4  ;;  %v2513_v11 = vshrl.u32 %v2329_v45, 16  ;;  %v4784_v7 = vld [vmem:[#allocation9_spill] sm:$0xff]  ;;  %v4786_v36 = vld [vmem:[#allocation11_spill] sm:$0xff]  ;;  %v4787_v50 = vld [vmem:[#allocation12_spill] sm:$0xff] }
  0xa6   : > { %3318 = vmatprep.mubr.msk.bf16.mxu1 %vm434_vm1, %v4354_v1  ;;  %3340 = vmatprep.mubr.msk.bf16.mxu0 %vm434_vm1, %v3092_v58  ;;  %v2051_v1 = vrot.slane %v2049_v17, 5  ;;  %v3094_v12 = vcombine.low %v2440_v15, %v2450_v48  ;;  %v2459_v33 = vrot.slane %v2458_v57, 4  ;;  %v2469_v41 = vrot.slane %v2468_v8, 4  ;;  %v4790_v24 = vld [vmem:[#allocation15_spill] sm:$0xff] }
  0xa7   : > { %v2473_v4 = vrot.slane %v2471_v55, 5  ;;  %v2502_v31 = vrot.slane %v2500_v2, 4  ;;  %v2505_v6 = vrot.slane %v2503_v27, 5  ;;  %v2511_v38 = vrot.slane %v2509_v18, 5 }
  0xa8   : > { %v2515_v14 = vrot.slane %v2513_v11, 4  ;;  %v2018_v16 = vsel %vm3739_vm4, %v4404_v34, %v4197_v22  ;;  %v2483_v25 = vrot.slane %v2482_v52, 4  ;;  %v2493_v9 = vrot.slane %v2492_v0, 4  ;;  %v4785_v34 = vld [vmem:[#allocation10_spill] sm:$0xff] }
  0xa9   : > { %v2497_v26 = vrot.slane %v2495_v39, 5  ;;  %v2028_v40 = vsel %vm3739_vm4, %v4410_v42, %v4419_v13  ;;  %v2042_v19 = vsel %vm3739_vm4, %v4443_v62, %v4780_v30  ;;  %v2052_v58 = vsel %vm3739_vm4, %v2047_v46, %v2051_v1  ;;  %v4788_v62 = vld [vmem:[#allocation13_spill] sm:$0xff] }
  0xaa   : > { %v2060_v22 = vor.u32 %v4784_v7, %v4783_v20  ;;  %v2070_v63 = vor.u32 %v4786_v36, %v4785_v34  ;;  %v2073_v42 = vshll.u32 %v1760_v35, 16  ;;  %v2464_v13 = vsel %vm3739_vm4, %v2459_v33, %v4434_v5  ;;  %v4564_v20 = vld [vmem:[%s4743_s2] ss:$0 sm:$0xff] }
  0xab   : > { %v2097_v21 = vshll.u32 %v1763_v49, 16  ;;  %v2474_v43 = vsel %vm3739_vm4, %v2469_v41, %v2473_v4  ;;  %v2516_v61 = vor.u32 %v2515_v14, %v2511_v38  ;;  %v2519_v54 = vshll.u32 %v2330_v53, 16 }
  0xac   : > { %v2084_v30 = vor.u32 %v4788_v62, %v4787_v50  ;;  %v2094_v17 = vor.u32 %v4790_v24, %v4789_v28  ;;  %v2488_v5 = vsel %vm3739_vm4, %v2483_v25, %v4437_v10  ;;  %v2113_v59 = vrot.slane %v2111_v44, 5 }
  0xad   : > { %3319 = vmatmul.mubr.msk.bf16.vlgmr.msra.gmra.mrb[24].mxu1 %vm434_vm1, %v4358_v32  ;;  %3341 = vmatmul.mubr.msk.bf16.gmra.mrb[20].mxu0 %vm434_vm1, %v3093_v47  ;;  %v2506_v32 = vor.u32 %v2505_v6, %v2502_v31  ;;  %v4791_v45 = vshrl.u32 %v4250_v23, 16  ;;  %v3076_v29 = vcombine.low %v2018_v16, %v2028_v40  ;;  %v3077_v57 = vcombine.low %v2042_v19, %v2052_v58  ;;  %v1766_v47 = vld [vmem:[%s3686_s19 + $0x68] sm:$0x1] }
  0xae   : > { %3322 = vmatprep.mubr.msk.bf16.mxu1 %vm434_vm1, %v4398_v37  ;;  %3344 = vmatprep.mubr.msk.bf16.mxu0 %vm434_vm1, %v3094_v12  ;;  %v2498_v37 = vsel %vm3739_vm4, %v2493_v9, %v2497_v26  ;;  %v2061_v8 = vrot.slane %v2060_v22, 4  ;;  %v2071_v55 = vrot.slane %v2070_v63, 4  ;;  %v2075_v15 = vrot.slane %v2073_v42, 5 }
  0xaf   : > { %v2117_v3 = vrot.slane %v4791_v45, 4  ;;  %v3095_v48 = vcombine.low %v2464_v13, %v2474_v43  ;;  %v3096_v2 = vcombine.low %v2488_v5, %v2498_v37  ;;  %v2507_v27 = vrot.slane %v2506_v32, 4 }
  0xb0   : > { %v2517_v52 = vrot.slane %v2516_v61, 4  ;;  %v2521_v10 = vrot.slane %v2519_v54, 5  ;;  %v2085_v0 = vrot.slane %v2084_v30, 4  ;;  %v2095_v39 = vrot.slane %v2094_v17, 4 }
  0xb1   : > { %v2099_v18 = vrot.slane %v2097_v21, 5  ;;  %v2066_v23 = vsel %vm3739_vm4, %v2061_v8, %v4785_v34  ;;  %v2076_v44 = vsel %vm3739_vm4, %v2071_v55, %v2075_v15  ;;  %v2108_v46 = vor.u32 %v4336_v56, %v4305_v51 }
  0xb2   : > { %v2118_v1 = vor.u32 %v2117_v3, %v2113_v59  ;;  %v2121_v11 = vshll.u32 %v1766_v47, 16  ;;  %v2512_v12 = vsel %vm3739_vm4, %v2507_v27, %v2511_v38  ;;  %v2522_v35 = vsel %vm3739_vm4, %v2517_v52, %v2521_v10 }
  0xb3   : > { %v2090_v33 = vsel %vm3739_vm4, %v2085_v0, %v4789_v28  ;;  %v2100_v41 = vsel %vm3739_vm4, %v2095_v39, %v2099_v18  ;;  %v3078_v51 = vcombine.low %v2066_v23, %v2076_v44  ;;  %v3097_v56 = vcombine.low %v2512_v12, %v2522_v35 }
  0xb4   : > { %v3079_v4 = vcombine.low %v2090_v33, %v2100_v41  ;;  %v2109_v49 = vrot.slane %v2108_v46, 4  ;;  %v2119_v31 = vrot.slane %v2118_v1, 4  ;;  %v2123_v6 = vrot.slane %v2121_v11, 5 }
  0xb5   : > { %3323 = vmatmul.mubr.msk.bf16.gmra.mrb[28].mxu1 %vm434_vm1, %v3076_v29  ;;  %3345 = vmatmul.mubr.msk.bf16.gmra.mrb[24].mxu0 %vm434_vm1, %v3095_v48 }
  0xb6   : > { %3326 = vmatprep.mubr.msk.bf16.mxu1 %vm434_vm1, %v3077_v57  ;;  %3348 = vmatprep.mubr.msk.bf16.mxu0 %vm434_vm1, %v3096_v2  ;;  %v2114_v38 = vsel %vm3739_vm4, %v2109_v49, %v2113_v59  ;;  %v2124_v14 = vsel %vm3739_vm4, %v2119_v31, %v2123_v6 }
  0xb7   : > { %v3080_v16 = vcombine.low %v2114_v38, %v2124_v14 }
  0xbd   : > { %3327 = vmatmul.mubr.msk.bf16.gmra.mrb[32].mxu1 %vm434_vm1, %v3078_v51  ;;  %3349 = vmatmul.mubr.msk.bf16.gmra.mrb[28].mxu0 %vm434_vm1, %v3097_v56 }
  0xbe   : > { %3330 = vmatprep.mubr.msk.bf16.mxu1 %vm434_vm1, %v3079_v4 }
  0xc5   : > { %3331 = vmatmul.mubr.msk.bf16.gmra.mrb[36].mxu1 %vm434_vm1, %v3080_v16 }
  0xf5   : > { %v4541_v25 = vpop.f32.mrb[0].mxu1 }
  0xf6   : > { %v4543_v9 = vpop.f32.mrb[1].mxu1  ;;  %v538_v4 = vadd.f32 %v4541_v25, %v4564_v20 }
  0xf7   : > { %v4545_v26 = vpop.f32.mrb[2].mxu1  ;;  %v530_v49 = vadd.f32 %v4564_v20, %v4543_v9 }
  0xf8   : > { %v4547_v53 = vpop.f32.mrb[3].mxu1  ;;  %v541_v6 = vadd.f32 %v4545_v26, %v4564_v20 }
  0xf9   : > { %v533_v16 = vadd.f32 %v4564_v20, %v4547_v53 }
  0xff   : > { %v4549_v40 = vpop.f32.mrb[4].mxu1 }
 0x100   : > { %v4551_v19 = vpop.f32.mrb[5].mxu1  ;;  %v554_v9 = vadd.f32 %v4549_v40, %v4564_v20 }
 0x101   : > { %v4553_v58 = vpop.f32.mrb[6].mxu1  ;;  %v546_v26 = vadd.f32 %v4564_v20, %v4551_v19 }
 0x102   : > { %v4555_v60 = vpop.f32.mrb[7].mxu1 }
 0x140   : > { %v3284_v7 = vpop.f32.mrb[8].mxu1 }
 0x141   : > { %v3378_v22 = vadd.f32 %v3284_v7, %v4564_v20  ;;  %v1648_v34 = vpop.f32.mrb[9].mxu1 }
 0x142   : > { %v3379_v36 = vadd.f32 %v4564_v20, %v1648_v34  ;;  %v3285_v63 = vpop.f32.mrb[10].mxu1 }
 0x143   : > { %1729 = vst [vmem:[%s4570_s20 + $0x10] sm:$0xff] %v3378_v22  ;;  %v3380_v42 = vadd.f32 %v3285_v63, %v4564_v20  ;;  %v1651_v13 = vpop.f32.mrb[11].mxu1  ;;  %v557_v63 = vadd.f32 %v4553_v58, %v4564_v20 }
 0x144   : > { %1727 = vst [vmem:[%s4570_s20] sm:$0xff] %v3379_v36  ;;  %v3381_v21 = vadd.f32 %v4564_v20, %v1651_v13 }
 0x145   : > { %1730 = vst [vmem:[%s4570_s20 + $0x18] sm:$0xff] %v3380_v42 }
 0x146   : > { %1728 = vst [vmem:[%s4570_s20 + $0x8] sm:$0xff] %v3381_v21  ;;  %v549_v21 = vadd.f32 %v4564_v20, %v4555_v60 }
 0x148   : > { %v3288_v43 = vpop.f32.mrb[12].mxu1 }
 0x149   : > { %v3382_v32 = vadd.f32 %v3288_v43, %v4564_v20  ;;  %v1664_v61 = vpop.f32.mrb[13].mxu1 }
 0x14a   : > { %v3383_v54 = vadd.f32 %v4564_v20, %v1664_v61  ;;  %v3289_v50 = vpop.f32.mrb[14].mxu1 }
 0x14b   : > { %1733 = vst [vmem:[%s4570_s20 + $0x30] sm:$0xff] %v3382_v32  ;;  %v3384_v62 = vadd.f32 %v3289_v50, %v4564_v20  ;;  %v1667_v30 = vpop.f32.mrb[15].mxu1 }
 0x14c   : > { %1731 = vst [vmem:[%s4570_s20 + $0x20] sm:$0xff] %v3383_v54  ;;  %v3385_v28 = vadd.f32 %v4564_v20, %v1667_v30 }
 0x14d   : > { %1734 = vst [vmem:[%s4570_s20 + $0x38] sm:$0xff] %v3384_v62 }
 0x14e   : > { %1732 = vst [vmem:[%s4570_s20 + $0x28] sm:$0xff] %v3385_v28 }
 0x150   : > { %v3292_v24 = vpop.f32.mrb[16].mxu1 }
 0x151   : > { %v3386_v17 = vadd.f32 %v3292_v24, %v4564_v20  ;;  %v1680_v5 = vpop.f32.mrb[17].mxu1 }
 0x152   : > { %v3387_v37 = vadd.f32 %v4564_v20, %v1680_v5  ;;  %v3293_v59 = vpop.f32.mrb[18].mxu1 }
 0x153   : > { %1737 = vst [vmem:[%s4570_s20 + $0x50] sm:$0xff] %v3386_v17  ;;  %v3388_v45 = vadd.f32 %v3293_v59, %v4564_v20  ;;  %v1683_v3 = vpop.f32.mrb[19].mxu1 }
 0x154   : > { %1735 = vst [vmem:[%s4570_s20 + $0x40] sm:$0xff] %v3387_v37  ;;  %v3389_v29 = vadd.f32 %v4564_v20, %v1683_v3 }
 0x155   : > { %1738 = vst [vmem:[%s4570_s20 + $0x58] sm:$0xff] %v3388_v45 }
 0x156   : > { %1736 = vst [vmem:[%s4570_s20 + $0x48] sm:$0xff] %v3389_v29 }
 0x158   : > { %v3296_v57 = vpop.f32.mrb[20].mxu1  ;;  %v3248_v8 = vpop.f32.mrb[0].mxu0 }
 0x159   : > { %v3390_v55 = vadd.f32 %v3296_v57, %v4564_v20  ;;  %v1696_v15 = vpop.f32.mrb[21].mxu1  ;;  %v3354_v48 = vadd.f32 %v3248_v8, %v4564_v20  ;;  %v1115_v2 = vpop.f32.mrb[1].mxu0 }
 0x15a   : > { %v3391_v27 = vadd.f32 %v4564_v20, %v1696_v15  ;;  %v3297_v52 = vpop.f32.mrb[22].mxu1  ;;  %v3355_v10 = vadd.f32 %v4564_v20, %v1115_v2  ;;  %v3249_v0 = vpop.f32.mrb[2].mxu0 }
 0x15b   : > { %1741 = vst [vmem:[%s4570_s20 + $0x70] sm:$0xff] %v3390_v55  ;;  %v3392_v39 = vadd.f32 %v3297_v52, %v4564_v20  ;;  %v1699_v18 = vpop.f32.mrb[23].mxu1  ;;  %1196 = vst [vmem:[%s4600_s28 + $0x10] sm:$0xff] %v3354_v48  ;;  %v3356_v47 = vadd.f32 %v3249_v0, %v4564_v20  ;;  %v1118_v23 = vpop.f32.mrb[3].mxu0 }
 0x15c   : > { %1739 = vst [vmem:[%s4570_s20 + $0x60] sm:$0xff] %v3391_v27  ;;  %v3393_v44 = vadd.f32 %v4564_v20, %v1699_v18  ;;  %1194 = vst [vmem:[%s4600_s28] sm:$0xff] %v3355_v10  ;;  %v3357_v46 = vadd.f32 %v4564_v20, %v1118_v23 }
 0x15d   : > { %1742 = vst [vmem:[%s4570_s20 + $0x78] sm:$0xff] %v3392_v39  ;;  %1197 = vst [vmem:[%s4600_s28 + $0x18] sm:$0xff] %v3356_v47 }
 0x15e   : > { %1740 = vst [vmem:[%s4570_s20 + $0x68] sm:$0xff] %v3393_v44  ;;  %1195 = vst [vmem:[%s4600_s28 + $0x8] sm:$0xff] %v3357_v46 }
 0x160   : > { %v3252_v1 = vpop.f32.mrb[4].mxu0 }
 0x161   : > { %v3358_v11 = vadd.f32 %v3252_v1, %v4564_v20  ;;  %v1131_v12 = vpop.f32.mrb[5].mxu0 }
 0x162   : > { %v3359_v35 = vadd.f32 %v4564_v20, %v1131_v12  ;;  %v3253_v33 = vpop.f32.mrb[6].mxu0 }
 0x163   : > { %1200 = vst [vmem:[%s4600_s28 + $0x30] sm:$0xff] %v3358_v11  ;;  %v3360_v41 = vadd.f32 %v3253_v33, %v4564_v20  ;;  %v1134_v51 = vpop.f32.mrb[7].mxu0 }
 0x164   : > { %1198 = vst [vmem:[%s4600_s28 + $0x20] sm:$0xff] %v3359_v35  ;;  %v3361_v56 = vadd.f32 %v4564_v20, %v1134_v51 }
 0x165   : > { %1201 = vst [vmem:[%s4600_s28 + $0x38] sm:$0xff] %v3360_v41 }
 0x166   : > { %1199 = vst [vmem:[%s4600_s28 + $0x28] sm:$0xff] %v3361_v56 }
 0x168   : > { %v3256_v31 = vpop.f32.mrb[8].mxu0 }
 0x169   : > { %v3363_v38 = vadd.f32 %v3256_v31, %v538_v4  ;;  %v1147_v14 = vpop.f32.mrb[9].mxu0 }
 0x16a   : > { %v3365_v7 = vadd.f32 %v1147_v14, %v530_v49  ;;  %v3257_v22 = vpop.f32.mrb[10].mxu0 }
 0x16b   : > { %1204 = vst [vmem:[%s4600_s28 + $0x50] sm:$0xff] %v3363_v38  ;;  %v3367_v34 = vadd.f32 %v3257_v22, %v541_v6  ;;  %v1150_v36 = vpop.f32.mrb[11].mxu0 }
 0x16c   : > { %1202 = vst [vmem:[%s4600_s28 + $0x40] sm:$0xff] %v3365_v7  ;;  %v3369_v25 = vadd.f32 %v1150_v36, %v533_v16 }
 0x16d   : > { %1205 = vst [vmem:[%s4600_s28 + $0x58] sm:$0xff] %v3367_v34 }
 0x16e   : > { %1203 = vst [vmem:[%s4600_s28 + $0x48] sm:$0xff] %v3369_v25 }
 0x170   : > { %v3260_v53 = vpop.f32.mrb[12].mxu0 }
 0x171   : > { %v3371_v42 = vadd.f32 %v3260_v53, %v554_v9  ;;  %v1163_v13 = vpop.f32.mrb[13].mxu0 }
 0x172   : > { %v3373_v43 = vadd.f32 %v1163_v13, %v546_v26  ;;  %v3261_v32 = vpop.f32.mrb[14].mxu0 }
 0x173   : > { %1208 = vst [vmem:[%s4600_s28 + $0x70] sm:$0xff] %v3371_v42  ;;  %v3375_v61 = vadd.f32 %v3261_v32, %v557_v63  ;;  %v1166_v54 = vpop.f32.mrb[15].mxu0 }
 0x174   : > { %1206 = vst [vmem:[%s4600_s28 + $0x60] sm:$0xff] %v3373_v43  ;;  %v3377_v40 = vadd.f32 %v1166_v54, %v549_v21 }
 0x175   : > { %1209 = vst [vmem:[%s4600_s28 + $0x78] sm:$0xff] %v3375_v61 }
 0x176   : > { %1207 = vst [vmem:[%s4600_s28 + $0x68] sm:$0xff] %v3377_v40 }
 0x178   : > { %v3338_v19 = vpop.f32.mrb[16].mxu0 }
 0x179   : > { %v2619_v58 = vadd.f32 %v3338_v19, %v4564_v20  ;;  %v2610_v60 = vpop.f32.mrb[17].mxu0 }
 0x17a   : > { %v2611_v50 = vadd.f32 %v4564_v20, %v2610_v60  ;;  %v3339_v62 = vpop.f32.mrb[18].mxu0 }
 0x17b   : > { %2675 = vst [vmem:[%s4654_s7 + $0x10] sm:$0xff] %v2619_v58  ;;  %v2622_v30 = vadd.f32 %v3339_v62, %v4564_v20  ;;  %v2613_v28 = vpop.f32.mrb[19].mxu0 }
 0x17c   : > { %2673 = vst [vmem:[%s4654_s7] sm:$0xff] %v2611_v50  ;;  %v2614_v24 = vadd.f32 %v4564_v20, %v2613_v28 }
 0x17d   : > { %2676 = vst [vmem:[%s4654_s7 + $0x18] sm:$0xff] %v2622_v30 }
 0x17e   : > { %2674 = vst [vmem:[%s4654_s7 + $0x8] sm:$0xff] %v2614_v24 }
 0x180   : > { %v3320_v17 = vpop.f32.mrb[24].mxu1  ;;  %v3342_v5 = vpop.f32.mrb[20].mxu0 }
 0x181   : > { %v3394_v37 = vadd.f32 %v3320_v17, %v4564_v20  ;;  %v2212_v59 = vpop.f32.mrb[25].mxu1  ;;  %v2635_v45 = vadd.f32 %v3342_v5, %v4564_v20  ;;  %v2626_v3 = vpop.f32.mrb[21].mxu0 }
 0x182   : > { %v3395_v29 = vadd.f32 %v4564_v20, %v2212_v59  ;;  %v3321_v57 = vpop.f32.mrb[26].mxu1  ;;  %v2627_v8 = vadd.f32 %v4564_v20, %v2626_v3  ;;  %v3343_v55 = vpop.f32.mrb[22].mxu0 }
 0x183   : > { %2293 = vst [vmem:[%s4668_s10 + $0x10] sm:$0xff] %v3394_v37  ;;  %v3396_v15 = vadd.f32 %v3321_v57, %v4564_v20  ;;  %v2215_v48 = vpop.f32.mrb[27].mxu1  ;;  %2679 = vst [vmem:[%s4654_s7 + $0x30] sm:$0xff] %v2635_v45  ;;  %v2638_v2 = vadd.f32 %v3343_v55, %v4564_v20  ;;  %v2629_v27 = vpop.f32.mrb[23].mxu0 }
 0x184   : > { %2291 = vst [vmem:[%s4668_s10] sm:$0xff] %v3395_v29  ;;  %v3397_v52 = vadd.f32 %v4564_v20, %v2215_v48  ;;  %2677 = vst [vmem:[%s4654_s7 + $0x20] sm:$0xff] %v2627_v8  ;;  %v2630_v10 = vadd.f32 %v4564_v20, %v2629_v27 }
 0x185   : > { %2294 = vst [vmem:[%s4668_s10 + $0x18] sm:$0xff] %v3396_v15  ;;  %2680 = vst [vmem:[%s4654_s7 + $0x38] sm:$0xff] %v2638_v2 }
 0x186   : > { %2292 = vst [vmem:[%s4668_s10 + $0x8] sm:$0xff] %v3397_v52  ;;  %2678 = vst [vmem:[%s4654_s7 + $0x28] sm:$0xff] %v2630_v10 }
 0x188   : > { %v3324_v0 = vpop.f32.mrb[28].mxu1  ;;  %v3346_v39 = vpop.f32.mrb[24].mxu0 }
 0x189   : > { %v3398_v18 = vadd.f32 %v3324_v0, %v4564_v20  ;;  %v2228_v47 = vpop.f32.mrb[29].mxu1  ;;  %v2651_v23 = vadd.f32 %v3346_v39, %v4564_v20  ;;  %v2642_v44 = vpop.f32.mrb[25].mxu0 }
 0x18a   : > { %v3399_v46 = vadd.f32 %v4564_v20, %v2228_v47  ;;  %v3325_v1 = vpop.f32.mrb[30].mxu1  ;;  %v2643_v11 = vadd.f32 %v4564_v20, %v2642_v44  ;;  %v3347_v12 = vpop.f32.mrb[26].mxu0 }
 0x18b   : > { %2297 = vst [vmem:[%s4668_s10 + $0x30] sm:$0xff] %v3398_v18  ;;  %v3400_v35 = vadd.f32 %v3325_v1, %v4564_v20  ;;  %v2231_v33 = vpop.f32.mrb[31].mxu1  ;;  %2683 = vst [vmem:[%s4654_s7 + $0x50] sm:$0xff] %v2651_v23  ;;  %v2654_v41 = vadd.f32 %v3347_v12, %v4564_v20  ;;  %v2645_v51 = vpop.f32.mrb[27].mxu0 }
 0x18c   : > { %2295 = vst [vmem:[%s4668_s10 + $0x20] sm:$0xff] %v3399_v46  ;;  %v3401_v56 = vadd.f32 %v4564_v20, %v2231_v33  ;;  %2681 = vst [vmem:[%s4654_s7 + $0x40] sm:$0xff] %v2643_v11  ;;  %v2646_v4 = vadd.f32 %v4564_v20, %v2645_v51 }
 0x18d   : > { %2298 = vst [vmem:[%s4668_s10 + $0x38] sm:$0xff] %v3400_v35  ;;  %2684 = vst [vmem:[%s4654_s7 + $0x58] sm:$0xff] %v2654_v41 }
 0x18e   : > { %2296 = vst [vmem:[%s4668_s10 + $0x28] sm:$0xff] %v3401_v56  ;;  %2682 = vst [vmem:[%s4654_s7 + $0x48] sm:$0xff] %v2646_v4 }
 0x190   : > { %v3328_v49 = vpop.f32.mrb[32].mxu1  ;;  %v3350_v31 = vpop.f32.mrb[28].mxu0 }
 0x191   : > { %v3402_v6 = vadd.f32 %v3328_v49, %v4564_v20  ;;  %v2244_v38 = vpop.f32.mrb[33].mxu1  ;;  %v2667_v14 = vadd.f32 %v3350_v31, %v4564_v20  ;;  %v2658_v16 = vpop.f32.mrb[29].mxu0 }
 0x192   : > { %v3403_v7 = vadd.f32 %v4564_v20, %v2244_v38  ;;  %v3329_v22 = vpop.f32.mrb[34].mxu1  ;;  %v2659_v34 = vadd.f32 %v4564_v20, %v2658_v16  ;;  %v3351_v36 = vpop.f32.mrb[30].mxu0 }
 0x193   : > { %2301 = vst [vmem:[%s4668_s10 + $0x50] sm:$0xff] %v3402_v6  ;;  %v3404_v25 = vadd.f32 %v3329_v22, %v4564_v20  ;;  %v2247_v9 = vpop.f32.mrb[35].mxu1  ;;  %2687 = vst [vmem:[%s4654_s7 + $0x70] sm:$0xff] %v2667_v14  ;;  %v2670_v26 = vadd.f32 %v3351_v36, %v4564_v20  ;;  %v2661_v53 = vpop.f32.mrb[31].mxu0 }
 0x194   : > { %2299 = vst [vmem:[%s4668_s10 + $0x40] sm:$0xff] %v3403_v7  ;;  %v3405_v63 = vadd.f32 %v4564_v20, %v2247_v9  ;;  %2685 = vst [vmem:[%s4654_s7 + $0x60] sm:$0xff] %v2659_v34  ;;  %v2662_v42 = vadd.f32 %v4564_v20, %v2661_v53 }
 0x195   : > { %2302 = vst [vmem:[%s4668_s10 + $0x58] sm:$0xff] %v3404_v25  ;;  %2688 = vst [vmem:[%s4654_s7 + $0x78] sm:$0xff] %v2670_v26 }
 0x196   : > { %2300 = vst [vmem:[%s4668_s10 + $0x48] sm:$0xff] %v3405_v63  ;;  %2686 = vst [vmem:[%s4654_s7 + $0x68] sm:$0xff] %v2662_v42 }
 0x198   : > { %v3332_v13 = vpop.f32.mrb[36].mxu1 }
 0x199   : > { %v3406_v21 = vadd.f32 %v3332_v13, %v4564_v20  ;;  %v2260_v43 = vpop.f32.mrb[37].mxu1 }
 0x19a   : > { %v3407_v32 = vadd.f32 %v4564_v20, %v2260_v43  ;;  %v3333_v61 = vpop.f32.mrb[38].mxu1 }
 0x19b   : > { %2305 = vst [vmem:[%s4668_s10 + $0x70] sm:$0xff] %v3406_v21  ;;  %v3408_v54 = vadd.f32 %v3333_v61, %v4564_v20  ;;  %v2263_v40 = vpop.f32.mrb[39].mxu1 }
 0x19c   : > { %2303 = vst [vmem:[%s4668_s10 + $0x60] sm:$0xff] %v3407_v32  ;;  %v3409_v19 = vadd.f32 %v4564_v20, %v2263_v40 }
 0x19d   : > { %2306 = vst [vmem:[%s4668_s10 + $0x78] sm:$0xff] %v3408_v54 }
 0x19e   : > { %2304 = vst [vmem:[%s4668_s10 + $0x68] sm:$0xff] %v3409_v19 }
 0x19f PF: > { %s17_s25 = sadd.s32 1, %s3588_s25   ;;  %s4792_s21 = smov %s3580_s23 }
 0x1a0   : > { %p14_p7 = scmp.ge.s32.totalorder %s17_s25, 6   ;;  %s4793_s22 = smov %s3584_s24 }
 0x1a1   : > { %s4794_s23 = smov %s4797_s26  ;;  %s4795_s24 = smov %s4801_s27 }
 0x1a2   :  { %16 = sbr.rel (!%p14_p7) target bundleno = 3 (0x3), region = 107 }

</bundles_post_ra>
